<compile_context>
chip_gen: v6e
topology: v6e:2x2x1
jax: 0.10.0
libtpu: 0.0.40
codegen_flags: <defaults>
</compile_context>

<pallas_src>
import jax
import jax.numpy as jnp
from jax.experimental import pallas as pl
from jax.experimental.pallas import tpu as pltpu


def _round_up(x, m):
    return ((x + m - 1) // m) * m


def lstm_fc_kernel(nvalid_ref, len_ref, xemb_ref, wih_ref, whh_ref, b_ref, wfc_ref, bfc_ref,
                   out_ref, h_scr, c_scr):
    # nvalid_ref: (1,)    int32   SMEM: number of time chunks that contain any real token
    # len_ref  : (Bp, 1)  int32   lengths (padded batch rows = 0)
    # xemb_ref : (Tc*Bp,E) bf16   time-major embedded chunk, row = t*Bp + b
    # wih_ref  : (E, 4Hp) bf16    gate order (i, f, g, o), each gate zero-padded H->Hp
    # whh_ref  : (Hp,4Hp) bf16
    # b_ref    : (1, 4Hp) f32     b_ih + b_hh
    # wfc_ref  : (Hp, Cp) bf16
    # bfc_ref  : (1, Cp)  f32
    # out_ref  : (Bp, Cp) f32     written on the last chunk only
    # h_scr/c_scr: (Bp,Hp) f32    state carried across time chunks
    chunk = pl.program_id(0)
    n_chunks = pl.num_programs(0)

    Bp = len_ref.shape[0]
    Hp = whh_ref.shape[0]
    Tc = xemb_ref.shape[0] // Bp

    @pl.when(chunk == 0)
    def _init():
        h_scr[...] = jnp.zeros_like(h_scr)
        c_scr[...] = jnp.zeros_like(c_scr)

    # Skip chunks that start past the longest sequence (state would not change anyway).
    @pl.when(chunk < nvalid_ref[0])
    def _compute():
        # Hoisted input projection: one big MXU matmul for the whole chunk, bias folded in.
        xw = (jnp.dot(xemb_ref[...], wih_ref[...], preferred_element_type=jnp.float32)
              + b_ref[...])                                    # (Tc*Bp, 4Hp) f32

        lens = len_ref[...]                                    # read once per chunk
        whh = whh_ref[...]                                     # bf16, VMEM-resident
        t0 = chunk * Tc

        # States live in vregs for the whole (fully unrolled) time loop.
        h = h_scr[...]
        c = c_scr[...]
        for t in range(Tc):                                    # static, unrolled
            gates = xw[t * Bp:(t + 1) * Bp, :] + jnp.dot(
                h.astype(jnp.bfloat16), whh, preferred_element_type=jnp.float32)
            i_g = jax.nn.sigmoid(gates[:, 0 * Hp:1 * Hp])       # lane-aligned gate slices
            f_g = jax.nn.sigmoid(gates[:, 1 * Hp:2 * Hp])
            g_g = jnp.tanh(gates[:, 2 * Hp:3 * Hp])
            o_g = jax.nn.sigmoid(gates[:, 3 * Hp:4 * Hp])
            c_new = f_g * c + i_g * g_g
            h_new = o_g * jnp.tanh(c_new)
            valid = lens > (t0 + t)                             # pack_padded_sequence mask
            h = jnp.where(valid, h_new, h)
            c = jnp.where(valid, c_new, c)
        h_scr[...] = h
        c_scr[...] = c

    @pl.when(chunk == n_chunks - 1)
    def _finalize():
        out_ref[...] = (jnp.dot(h_scr[...].astype(jnp.bfloat16), wfc_ref[...],
                                preferred_element_type=jnp.float32)
                        + bfc_ref[...])


def text_classifier_forward(text, text_lengths, params, *, time_chunk=8):
    """text: (B, T) int32 token ids; text_lengths: (B,) int32. Returns (B, num_classes) f32."""
    emb_table, wih, whh, b, wfc, bfc = params
    B, T = text.shape
    E = emb_table.shape[1]
    H = whh.shape[0]
    C = wfc.shape[1]

    Bp = max(8, _round_up(B, 8))          # sublane-aligned batch
    Hp = _round_up(H, 128)                # lane-aligned hidden (per-gate)
    Cp = _round_up(C, 128)                # lane-dense output stores
    Tc = min(time_chunk, T)
    Tp = _round_up(T, Tc)
    n_chunks = Tp // Tc

    # --- per-gate padding (gate order i, f, g, o); zero pads keep padded lanes inert ---
    def pad_gates_last(w):
        lead = w.shape[:-1]
        w4 = w.reshape(lead + (4, H))
        w4 = jnp.pad(w4, [(0, 0)] * len(lead) + [(0, 0), (0, Hp - H)])
        return w4.reshape(lead + (4 * Hp,))

    wih_p = pad_gates_last(wih).astype(jnp.bfloat16)                                  # (E, 4Hp)
    whh_p = jnp.pad(pad_gates_last(whh), ((0, Hp - H), (0, 0))).astype(jnp.bfloat16)  # (Hp, 4Hp)
    b_p = pad_gates_last(b.reshape(1, 4 * H)).astype(jnp.float32)                     # (1, 4Hp)
    wfc_p = jnp.pad(wfc, ((0, Hp - H), (0, Cp - C))).astype(jnp.bfloat16)             # (Hp, Cp)
    bfc_p = jnp.pad(bfc.reshape(1, C), ((0, 0), (0, Cp - C))).astype(jnp.float32)     # (1, Cp)

    # --- batch / time padding; padded batch rows get length 0 so they never update ---
    text_p = jnp.pad(text.astype(jnp.int32), ((0, Bp - B), (0, 0)))
    lens_p = jnp.pad(text_lengths.astype(jnp.int32), (0, Bp - B)).reshape(Bp, 1)

    # Number of chunks containing any real token (scalar-prefetched; clamps DMA + skips compute).
    max_len = jnp.max(lens_p)
    n_valid = jnp.clip((max_len + Tc - 1) // Tc, 1, n_chunks).astype(jnp.int32).reshape((1,))

    # Glue: gather embeddings directly in time-major order (no separate transpose pass).
    emb_tm = jnp.take(emb_table.astype(jnp.bfloat16), text_p.T, axis=0)   # (T, Bp, E)
    emb_tm = jnp.pad(emb_tm, ((0, Tp - T), (0, 0), (0, 0)))               # padded steps masked
    emb2d = emb_tm.reshape(Tp * Bp, E)                                    # row = t*Bp + b

    out = pl.pallas_call(
        lstm_fc_kernel,
        out_shape=jax.ShapeDtypeStruct((Bp, Cp), jnp.float32),
        grid_spec=pltpu.PrefetchScalarGridSpec(
            num_scalar_prefetch=1,                                # n_valid -> SMEM
            grid=(n_chunks,),
            in_specs=[
                pl.BlockSpec((Bp, 1), lambda i, nv: (0, 0)),                          # lengths
                pl.BlockSpec((Tc * Bp, E),
                             lambda i, nv: (jnp.minimum(i, nv[0] - 1), 0)),           # time chunks
                pl.BlockSpec((E, 4 * Hp), lambda i, nv: (0, 0)),                      # W_ih
                pl.BlockSpec((Hp, 4 * Hp), lambda i, nv: (0, 0)),                     # W_hh
                pl.BlockSpec((1, 4 * Hp), lambda i, nv: (0, 0)),                      # b_ih + b_hh
                pl.BlockSpec((Hp, Cp), lambda i, nv: (0, 0)),                         # W_fc
                pl.BlockSpec((1, Cp), lambda i, nv: (0, 0)),                          # b_fc
            ],
            out_specs=pl.BlockSpec((Bp, Cp), lambda i, nv: (0, 0)),
            scratch_shapes=[
                pltpu.VMEM((Bp, Hp), jnp.float32),   # h state (across chunks)
                pltpu.VMEM((Bp, Hp), jnp.float32),   # c state (across chunks)
            ],
        ),
        compiler_params=pltpu.CompilerParams(
            dimension_semantics=("arbitrary",),       # serial recurrence over time chunks
            vmem_limit_bytes=32 * 1024 * 1024,        # explicit, safe on v5e/v6e/v7x
        ),
    )(n_valid, lens_p, emb2d, wih_p, whh_p, b_p, wfc_p, bfc_p)

    return out[:B, :C]


def reference_forward(text, text_lengths, params):
    """Pure-JAX reference with matching bf16 rounding of matmul inputs."""
    emb_table, wih, whh, b, wfc, bfc = params
    B, T = text.shape
    H = whh.shape[0]

    def bf(x):
        return x.astype(jnp.bfloat16).astype(jnp.float32)

    emb = bf(jnp.take(emb_table.astype(jnp.bfloat16), text, axis=0))   # (B, T, E)
    wih_b, whh_b, wfc_b = bf(wih), bf(whh), bf(wfc)
    h = jnp.zeros((B, H), jnp.float32)
    c = jnp.zeros((B, H), jnp.float32)
    for t in range(T):
        gates = emb[:, t, :] @ wih_b + bf(h) @ whh_b + b
        i_g = jax.nn.sigmoid(gates[:, 0 * H:1 * H])
        f_g = jax.nn.sigmoid(gates[:, 1 * H:2 * H])
        g_g = jnp.tanh(gates[:, 2 * H:3 * H])
        o_g = jax.nn.sigmoid(gates[:, 3 * H:4 * H])
        c_new = f_g * c + i_g * g_g
        h_new = o_g * jnp.tanh(c_new)
        valid = (text_lengths > t).reshape(B, 1)
        h = jnp.where(valid, h_new, h)
        c = jnp.where(valid, c_new, c)
    return bf(h) @ wfc_b + bfc


def init_params(key, vocab_size, embed_dim, hidden_dim, num_classes):
    ks = jax.random.split(key, 7)
    scale = 0.1
    emb_table = scale * jax.random.normal(ks[0], (vocab_size, embed_dim), jnp.float32)
    # PyTorch stores weight_ih (4H, E) and computes x @ W^T; we keep the transposed form.
    wih = scale * jax.random.normal(ks[1], (embed_dim, 4 * hidden_dim), jnp.float32)
    whh = scale * jax.random.normal(ks[2], (hidden_dim, 4 * hidden_dim), jnp.float32)
    b_ih = scale * jax.random.normal(ks[3], (4 * hidden_dim,), jnp.float32)
    b_hh = scale * jax.random.normal(ks[4], (4 * hidden_dim,), jnp.float32)
    b = (b_ih + b_hh).reshape(1, 4 * hidden_dim)
    wfc = scale * jax.random.normal(ks[5], (hidden_dim, num_classes), jnp.float32)
    bfc = scale * jax.random.normal(ks[6], (1, num_classes), jnp.float32)
    return emb_table, wih, whh, b, wfc, bfc


if __name__ == "__main__":
    vocab_size, embed_dim, hidden_dim, num_classes = 50, 32, 32, 4
    B, T = 2, 8

    key = jax.random.PRNGKey(0)
    k_param, k_text = jax.random.split(key)
    params = init_params(k_param, vocab_size, embed_dim, hidden_dim, num_classes)

    text = jax.random.randint(k_text, (B, T), 0, vocab_size, dtype=jnp.int32)
    text_lengths = jnp.array([8, 5], dtype=jnp.int32)   # padded seqs; masked like pack_padded_sequence

    logits = text_classifier_forward(text, text_lengths, params)
    jax.block_until_ready(logits)
    assert logits.shape == (B, num_classes)

    ref = reference_forward(text, text_lengths, params)
    jax.block_until_ready(ref)
    assert jnp.allclose(logits, ref, atol=2e-2, rtol=2e-2), (logits, ref)

    print("KERNEL_OK")
</pallas_src>

<mosaic_0001>
module attributes {stable_mosaic.version = 11 : i64} {
  func.func @lstm_fc_kernel(%arg0: i32, %arg1: memref<1xi32, #tpu.memory_space<smem>>, %arg2: memref<8x1xi32, #tpu.memory_space<vmem>>, %arg3: memref<64x32xbf16, #tpu.memory_space<vmem>>, %arg4: memref<32x512xbf16, #tpu.memory_space<vmem>>, %arg5: memref<128x512xbf16, #tpu.memory_space<vmem>>, %arg6: memref<1x512xf32, #tpu.memory_space<vmem>>, %arg7: memref<128x128xbf16, #tpu.memory_space<vmem>>, %arg8: memref<1x128xf32, #tpu.memory_space<vmem>>, %arg9: memref<8x128xf32, #tpu.memory_space<vmem>>, %arg10: memref<8x128xf32, #tpu.memory_space<vmem>>, %arg11: memref<8x128xf32, #tpu.memory_space<vmem>>) attributes {dimension_semantics = [#tpu.dimension_semantics<arbitrary>], iteration_bounds = array<i64: 1>, scalar_prefetch = 1 : i64, scratch_operands = 2 : i64, tpu.core_type = #tpu.core_type<tc>, window_params = [{pipeline_mode = #tpu.pipeline_mode<synchronous>, transform_indices = @transform_0, window_bounds = array<i64: 8, 1>}, {transform_indices = @transform_1, window_bounds = array<i64: 64, 32>}, {pipeline_mode = #tpu.pipeline_mode<synchronous>, transform_indices = @transform_2, window_bounds = array<i64: 32, 512>}, {pipeline_mode = #tpu.pipeline_mode<synchronous>, transform_indices = @transform_3, window_bounds = array<i64: 128, 512>}, {pipeline_mode = #tpu.pipeline_mode<synchronous>, transform_indices = @transform_4, window_bounds = array<i64: 1, 512>}, {pipeline_mode = #tpu.pipeline_mode<synchronous>, transform_indices = @transform_5, window_bounds = array<i64: 128, 128>}, {pipeline_mode = #tpu.pipeline_mode<synchronous>, transform_indices = @transform_6, window_bounds = array<i64: 1, 128>}, {pipeline_mode = #tpu.pipeline_mode<synchronous>, transform_indices = @transform_7, window_bounds = array<i64: 8, 128>}]} {
    %c0_i32 = arith.constant 0 : i32
    %0 = arith.cmpi eq, %arg0, %c0_i32 : i32
    %1 = arith.extui %0 : i1 to i32
    %c0_i32_0 = arith.constant 0 : i32
    %2 = arith.cmpi ne, %1, %c0_i32_0 : i32
    scf.if %2 {
      %cst = arith.constant 0.000000e+00 : f32
      %10 = vector.broadcast %cst : f32 to vector<8x128xf32>
      %c0_4 = arith.constant 0 : index
      %c0_5 = arith.constant 0 : index
      %11 = vector.load %arg10[%c0_4, %c0_5] : memref<8x128xf32, #tpu.memory_space<vmem>>, vector<8x128xf32>
      tpu.vector_store %arg10[%c0_4, %c0_5], %10 {strides = array<i32>} : memref<8x128xf32, #tpu.memory_space<vmem>>, vector<8x128xf32>,
      %cst_6 = arith.constant 0.000000e+00 : f32
      %12 = vector.broadcast %cst_6 : f32 to vector<8x128xf32>
      %c0_7 = arith.constant 0 : index
      %c0_8 = arith.constant 0 : index
      %13 = vector.load %arg11[%c0_7, %c0_8] : memref<8x128xf32, #tpu.memory_space<vmem>>, vector<8x128xf32>
      tpu.vector_store %arg11[%c0_7, %c0_8], %12 {strides = array<i32>} : memref<8x128xf32, #tpu.memory_space<vmem>>, vector<8x128xf32>,
    } else {
    }
    %c0 = arith.constant 0 : index
    %3 = memref.load %arg1[%c0] : memref<1xi32, #tpu.memory_space<smem>>
    %4 = arith.cmpi slt, %arg0, %3 : i32
    %5 = arith.extui %4 : i1 to i32
    %c0_i32_1 = arith.constant 0 : i32
    %6 = arith.cmpi ne, %5, %c0_i32_1 : i32
    scf.if %6 {
      %c0_4 = arith.constant 0 : index
      %c0_5 = arith.constant 0 : index
      %10 = vector.load %arg3[%c0_4, %c0_5] : memref<64x32xbf16, #tpu.memory_space<vmem>>, vector<64x32xbf16>
      %c0_6 = arith.constant 0 : index
      %c0_7 = arith.constant 0 : index
      %11 = vector.load %arg4[%c0_6, %c0_7] : memref<32x512xbf16, #tpu.memory_space<vmem>>, vector<32x512xbf16>
      %cst = arith.constant dense<0.000000e+00> : vector<64x512xf32>
      %12 = tpu.matmul %10, %11, %cst {dimension_numbers = #tpu.dot_dimension_numbers<[1], [0], [0], [1], [0, 0, 1, 1], [], []>} : vector<64x32xbf16>, vector<32x512xbf16>, vector<64x512xf32> -> vector<64x512xf32>
      %c0_8 = arith.constant 0 : index
      %c0_9 = arith.constant 0 : index
      %13 = vector.load %arg6[%c0_8, %c0_9] : memref<1x512xf32, #tpu.memory_space<vmem>>, vector<1x512xf32>
      %14 = vector.broadcast %13 : vector<1x512xf32> to vector<64x512xf32>
      %15 = arith.addf %12, %14 : vector<64x512xf32>
      %c0_10 = arith.constant 0 : index
      %c0_11 = arith.constant 0 : index
      %16 = vector.load %arg2[%c0_10, %c0_11] : memref<8x1xi32, #tpu.memory_space<vmem>>, vector<8x1xi32>
      %c0_12 = arith.constant 0 : index
      %c0_13 = arith.constant 0 : index
      %17 = vector.load %arg5[%c0_12, %c0_13] : memref<128x512xbf16, #tpu.memory_space<vmem>>, vector<128x512xbf16>
      %c8_i32 = arith.constant 8 : i32
      %18 = arith.muli %arg0, %c8_i32 : i32
      %c0_14 = arith.constant 0 : index
      %c0_15 = arith.constant 0 : index
      %19 = vector.load %arg10[%c0_14, %c0_15] : memref<8x128xf32, #tpu.memory_space<vmem>>, vector<8x128xf32>
      %c0_16 = arith.constant 0 : index
      %c0_17 = arith.constant 0 : index
      %20 = vector.load %arg11[%c0_16, %c0_17] : memref<8x128xf32, #tpu.memory_space<vmem>>, vector<8x128xf32>
      %21 = vector.extract_strided_slice %15 {offsets = [0, 0], sizes = [8, 512], strides = [1, 1]} : vector<64x512xf32> to vector<8x512xf32>
      %22 = arith.truncf %19 : vector<8x128xf32> to vector<8x128xbf16>
      %cst_18 = arith.constant dense<0.000000e+00> : vector<8x512xf32>
      %23 = tpu.matmul %22, %17, %cst_18 {dimension_numbers = #tpu.dot_dimension_numbers<[1], [0], [0], [1], [0, 0, 1, 1], [], []>} : vector<8x128xbf16>, vector<128x512xbf16>, vector<8x512xf32> -> vector<8x512xf32>
      %24 = arith.addf %21, %23 : vector<8x512xf32>
      %25 = vector.extract_strided_slice %24 {offsets = [0, 0], sizes = [8, 128], strides = [1, 1]} : vector<8x512xf32> to vector<8x128xf32>
      %26 = arith.negf %25 : vector<8x128xf32>
      %27 = math.exp %26 : vector<8x128xf32>
      %cst_19 = arith.constant 1.000000e+00 : f32
      %28 = vector.broadcast %cst_19 : f32 to vector<8x128xf32>
      %29 = arith.addf %28, %27 : vector<8x128xf32>
      %30 = arith.divf %28, %29 : vector<8x128xf32>
      %31 = vector.extract_strided_slice %24 {offsets = [0, 128], sizes = [8, 128], strides = [1, 1]} : vector<8x512xf32> to vector<8x128xf32>
      %32 = arith.negf %31 : vector<8x128xf32>
      %33 = math.exp %32 : vector<8x128xf32>
      %cst_20 = arith.constant 1.000000e+00 : f32
      %34 = vector.broadcast %cst_20 : f32 to vector<8x128xf32>
      %35 = arith.addf %34, %33 : vector<8x128xf32>
      %36 = arith.divf %34, %35 : vector<8x128xf32>
      %37 = vector.extract_strided_slice %24 {offsets = [0, 256], sizes = [8, 128], strides = [1, 1]} : vector<8x512xf32> to vector<8x128xf32>
      %38 = math.tanh %37 : vector<8x128xf32>
      %39 = vector.extract_strided_slice %24 {offsets = [0, 384], sizes = [8, 128], strides = [1, 1]} : vector<8x512xf32> to vector<8x128xf32>
      %40 = arith.negf %39 : vector<8x128xf32>
      %41 = math.exp %40 : vector<8x128xf32>
      %cst_21 = arith.constant 1.000000e+00 : f32
      %42 = vector.broadcast %cst_21 : f32 to vector<8x128xf32>
      %43 = arith.addf %42, %41 : vector<8x128xf32>
      %44 = arith.divf %42, %43 : vector<8x128xf32>
      %45 = arith.mulf %36, %20 : vector<8x128xf32>
      %46 = arith.mulf %30, %38 : vector<8x128xf32>
      %47 = arith.addf %45, %46 : vector<8x128xf32>
      %48 = math.tanh %47 : vector<8x128xf32>
      %49 = arith.mulf %44, %48 : vector<8x128xf32>
      %c0_i32_22 = arith.constant 0 : i32
      %50 = arith.addi %18, %c0_i32_22 : i32
      %51 = vector.broadcast %50 : i32 to vector<8x1xi32>
      %52 = arith.cmpi sgt, %16, %51 : vector<8x1xi32>
      %53 = vector.shape_cast %52 : vector<8x1xi1> to vector<8x1xi1>
      %54 = vector.broadcast %53 : vector<8x1xi1> to vector<8x128xi1>
      %55 = arith.select %54, %49, %19 : vector<8x128xi1>, vector<8x128xf32>
      %56 = vector.shape_cast %52 : vector<8x1xi1> to vector<8x1xi1>
      %57 = vector.broadcast %56 : vector<8x1xi1> to vector<8x128xi1>
      %58 = arith.select %57, %47, %20 : vector<8x128xi1>, vector<8x128xf32>
      %59 = vector.extract_strided_slice %15 {offsets = [8, 0], sizes = [8, 512], strides = [1, 1]} : vector<64x512xf32> to vector<8x512xf32>
      %60 = arith.truncf %55 : vector<8x128xf32> to vector<8x128xbf16>
      %cst_23 = arith.constant dense<0.000000e+00> : vector<8x512xf32>
      %61 = tpu.matmul %60, %17, %cst_23 {dimension_numbers = #tpu.dot_dimension_numbers<[1], [0], [0], [1], [0, 0, 1, 1], [], []>} : vector<8x128xbf16>, vector<128x512xbf16>, vector<8x512xf32> -> vector<8x512xf32>
      %62 = arith.addf %59, %61 : vector<8x512xf32>
      %63 = vector.extract_strided_slice %62 {offsets = [0, 0], sizes = [8, 128], strides = [1, 1]} : vector<8x512xf32> to vector<8x128xf32>
      %64 = arith.negf %63 : vector<8x128xf32>
      %65 = math.exp %64 : vector<8x128xf32>
      %cst_24 = arith.constant 1.000000e+00 : f32
      %66 = vector.broadcast %cst_24 : f32 to vector<8x128xf32>
      %67 = arith.addf %66, %65 : vector<8x128xf32>
      %68 = arith.divf %66, %67 : vector<8x128xf32>
      %69 = vector.extract_strided_slice %62 {offsets = [0, 128], sizes = [8, 128], strides = [1, 1]} : vector<8x512xf32> to vector<8x128xf32>
      %70 = arith.negf %69 : vector<8x128xf32>
      %71 = math.exp %70 : vector<8x128xf32>
      %cst_25 = arith.constant 1.000000e+00 : f32
      %72 = vector.broadcast %cst_25 : f32 to vector<8x128xf32>
      %73 = arith.addf %72, %71 : vector<8x128xf32>
      %74 = arith.divf %72, %73 : vector<8x128xf32>
      %75 = vector.extract_strided_slice %62 {offsets = [0, 256], sizes = [8, 128], strides = [1, 1]} : vector<8x512xf32> to vector<8x128xf32>
      %76 = math.tanh %75 : vector<8x128xf32>
      %77 = vector.extract_strided_slice %62 {offsets = [0, 384], sizes = [8, 128], strides = [1, 1]} : vector<8x512xf32> to vector<8x128xf32>
      %78 = arith.negf %77 : vector<8x128xf32>
      %79 = math.exp %78 : vector<8x128xf32>
      %cst_26 = arith.constant 1.000000e+00 : f32
      %80 = vector.broadcast %cst_26 : f32 to vector<8x128xf32>
      %81 = arith.addf %80, %79 : vector<8x128xf32>
      %82 = arith.divf %80, %81 : vector<8x128xf32>
      %83 = arith.mulf %74, %58 : vector<8x128xf32>
      %84 = arith.mulf %68, %76 : vector<8x128xf32>
      %85 = arith.addf %83, %84 : vector<8x128xf32>
      %86 = math.tanh %85 : vector<8x128xf32>
      %87 = arith.mulf %82, %86 : vector<8x128xf32>
      %c1_i32 = arith.constant 1 : i32
      %88 = arith.addi %18, %c1_i32 : i32
      %89 = vector.broadcast %88 : i32 to vector<8x1xi32>
      %90 = arith.cmpi sgt, %16, %89 : vector<8x1xi32>
      %91 = vector.shape_cast %90 : vector<8x1xi1> to vector<8x1xi1>
      %92 = vector.broadcast %91 : vector<8x1xi1> to vector<8x128xi1>
      %93 = arith.select %92, %87, %55 : vector<8x128xi1>, vector<8x128xf32>
      %94 = vector.shape_cast %90 : vector<8x1xi1> to vector<8x1xi1>
      %95 = vector.broadcast %94 : vector<8x1xi1> to vector<8x128xi1>
      %96 = arith.select %95, %85, %58 : vector<8x128xi1>, vector<8x128xf32>
      %97 = vector.extract_strided_slice %15 {offsets = [16, 0], sizes = [8, 512], strides = [1, 1]} : vector<64x512xf32> to vector<8x512xf32>
      %98 = arith.truncf %93 : vector<8x128xf32> to vector<8x128xbf16>
      %cst_27 = arith.constant dense<0.000000e+00> : vector<8x512xf32>
      %99 = tpu.matmul %98, %17, %cst_27 {dimension_numbers = #tpu.dot_dimension_numbers<[1], [0], [0], [1], [0, 0, 1, 1], [], []>} : vector<8x128xbf16>, vector<128x512xbf16>, vector<8x512xf32> -> vector<8x512xf32>
      %100 = arith.addf %97, %99 : vector<8x512xf32>
      %101 = vector.extract_strided_slice %100 {offsets = [0, 0], sizes = [8, 128], strides = [1, 1]} : vector<8x512xf32> to vector<8x128xf32>
      %102 = arith.negf %101 : vector<8x128xf32>
      %103 = math.exp %102 : vector<8x128xf32>
      %cst_28 = arith.constant 1.000000e+00 : f32
      %104 = vector.broadcast %cst_28 : f32 to vector<8x128xf32>
      %105 = arith.addf %104, %103 : vector<8x128xf32>
      %106 = arith.divf %104, %105 : vector<8x128xf32>
      %107 = vector.extract_strided_slice %100 {offsets = [0, 128], sizes = [8, 128], strides = [1, 1]} : vector<8x512xf32> to vector<8x128xf32>
      %108 = arith.negf %107 : vector<8x128xf32>
      %109 = math.exp %108 : vector<8x128xf32>
      %cst_29 = arith.constant 1.000000e+00 : f32
      %110 = vector.broadcast %cst_29 : f32 to vector<8x128xf32>
      %111 = arith.addf %110, %109 : vector<8x128xf32>
      %112 = arith.divf %110, %111 : vector<8x128xf32>
      %113 = vector.extract_strided_slice %100 {offsets = [0, 256], sizes = [8, 128], strides = [1, 1]} : vector<8x512xf32> to vector<8x128xf32>
      %114 = math.tanh %113 : vector<8x128xf32>
      %115 = vector.extract_strided_slice %100 {offsets = [0, 384], sizes = [8, 128], strides = [1, 1]} : vector<8x512xf32> to vector<8x128xf32>
      %116 = arith.negf %115 : vector<8x128xf32>
      %117 = math.exp %116 : vector<8x128xf32>
      %cst_30 = arith.constant 1.000000e+00 : f32
      %118 = vector.broadcast %cst_30 : f32 to vector<8x128xf32>
      %119 = arith.addf %118, %117 : vector<8x128xf32>
      %120 = arith.divf %118, %119 : vector<8x128xf32>
      %121 = arith.mulf %112, %96 : vector<8x128xf32>
      %122 = arith.mulf %106, %114 : vector<8x128xf32>
      %123 = arith.addf %121, %122 : vector<8x128xf32>
      %124 = math.tanh %123 : vector<8x128xf32>
      %125 = arith.mulf %120, %124 : vector<8x128xf32>
      %c2_i32 = arith.constant 2 : i32
      %126 = arith.addi %18, %c2_i32 : i32
      %127 = vector.broadcast %126 : i32 to vector<8x1xi32>
      %128 = arith.cmpi sgt, %16, %127 : vector<8x1xi32>
      %129 = vector.shape_cast %128 : vector<8x1xi1> to vector<8x1xi1>
      %130 = vector.broadcast %129 : vector<8x1xi1> to vector<8x128xi1>
      %131 = arith.select %130, %125, %93 : vector<8x128xi1>, vector<8x128xf32>
      %132 = vector.shape_cast %128 : vector<8x1xi1> to vector<8x1xi1>
      %133 = vector.broadcast %132 : vector<8x1xi1> to vector<8x128xi1>
      %134 = arith.select %133, %123, %96 : vector<8x128xi1>, vector<8x128xf32>
      %135 = vector.extract_strided_slice %15 {offsets = [24, 0], sizes = [8, 512], strides = [1, 1]} : vector<64x512xf32> to vector<8x512xf32>
      %136 = arith.truncf %131 : vector<8x128xf32> to vector<8x128xbf16>
      %cst_31 = arith.constant dense<0.000000e+00> : vector<8x512xf32>
      %137 = tpu.matmul %136, %17, %cst_31 {dimension_numbers = #tpu.dot_dimension_numbers<[1], [0], [0], [1], [0, 0, 1, 1], [], []>} : vector<8x128xbf16>, vector<128x512xbf16>, vector<8x512xf32> -> vector<8x512xf32>
      %138 = arith.addf %135, %137 : vector<8x512xf32>
      %139 = vector.extract_strided_slice %138 {offsets = [0, 0], sizes = [8, 128], strides = [1, 1]} : vector<8x512xf32> to vector<8x128xf32>
      %140 = arith.negf %139 : vector<8x128xf32>
      %141 = math.exp %140 : vector<8x128xf32>
      %cst_32 = arith.constant 1.000000e+00 : f32
      %142 = vector.broadcast %cst_32 : f32 to vector<8x128xf32>
      %143 = arith.addf %142, %141 : vector<8x128xf32>
      %144 = arith.divf %142, %143 : vector<8x128xf32>
      %145 = vector.extract_strided_slice %138 {offsets = [0, 128], sizes = [8, 128], strides = [1, 1]} : vector<8x512xf32> to vector<8x128xf32>
      %146 = arith.negf %145 : vector<8x128xf32>
      %147 = math.exp %146 : vector<8x128xf32>
      %cst_33 = arith.constant 1.000000e+00 : f32
      %148 = vector.broadcast %cst_33 : f32 to vector<8x128xf32>
      %149 = arith.addf %148, %147 : vector<8x128xf32>
      %150 = arith.divf %148, %149 : vector<8x128xf32>
      %151 = vector.extract_strided_slice %138 {offsets = [0, 256], sizes = [8, 128], strides = [1, 1]} : vector<8x512xf32> to vector<8x128xf32>
      %152 = math.tanh %151 : vector<8x128xf32>
      %153 = vector.extract_strided_slice %138 {offsets = [0, 384], sizes = [8, 128], strides = [1, 1]} : vector<8x512xf32> to vector<8x128xf32>
      %154 = arith.negf %153 : vector<8x128xf32>
      %155 = math.exp %154 : vector<8x128xf32>
      %cst_34 = arith.constant 1.000000e+00 : f32
      %156 = vector.broadcast %cst_34 : f32 to vector<8x128xf32>
      %157 = arith.addf %156, %155 : vector<8x128xf32>
      %158 = arith.divf %156, %157 : vector<8x128xf32>
      %159 = arith.mulf %150, %134 : vector<8x128xf32>
      %160 = arith.mulf %144, %152 : vector<8x128xf32>
      %161 = arith.addf %159, %160 : vector<8x128xf32>
      %162 = math.tanh %161 : vector<8x128xf32>
      %163 = arith.mulf %158, %162 : vector<8x128xf32>
      %c3_i32 = arith.constant 3 : i32
      %164 = arith.addi %18, %c3_i32 : i32
      %165 = vector.broadcast %164 : i32 to vector<8x1xi32>
      %166 = arith.cmpi sgt, %16, %165 : vector<8x1xi32>
      %167 = vector.shape_cast %166 : vector<8x1xi1> to vector<8x1xi1>
      %168 = vector.broadcast %167 : vector<8x1xi1> to vector<8x128xi1>
      %169 = arith.select %168, %163, %131 : vector<8x128xi1>, vector<8x128xf32>
      %170 = vector.shape_cast %166 : vector<8x1xi1> to vector<8x1xi1>
      %171 = vector.broadcast %170 : vector<8x1xi1> to vector<8x128xi1>
      %172 = arith.select %171, %161, %134 : vector<8x128xi1>, vector<8x128xf32>
      %173 = vector.extract_strided_slice %15 {offsets = [32, 0], sizes = [8, 512], strides = [1, 1]} : vector<64x512xf32> to vector<8x512xf32>
      %174 = arith.truncf %169 : vector<8x128xf32> to vector<8x128xbf16>
      %cst_35 = arith.constant dense<0.000000e+00> : vector<8x512xf32>
      %175 = tpu.matmul %174, %17, %cst_35 {dimension_numbers = #tpu.dot_dimension_numbers<[1], [0], [0], [1], [0, 0, 1, 1], [], []>} : vector<8x128xbf16>, vector<128x512xbf16>, vector<8x512xf32> -> vector<8x512xf32>
      %176 = arith.addf %173, %175 : vector<8x512xf32>
      %177 = vector.extract_strided_slice %176 {offsets = [0, 0], sizes = [8, 128], strides = [1, 1]} : vector<8x512xf32> to vector<8x128xf32>
      %178 = arith.negf %177 : vector<8x128xf32>
      %179 = math.exp %178 : vector<8x128xf32>
      %cst_36 = arith.constant 1.000000e+00 : f32
      %180 = vector.broadcast %cst_36 : f32 to vector<8x128xf32>
      %181 = arith.addf %180, %179 : vector<8x128xf32>
      %182 = arith.divf %180, %181 : vector<8x128xf32>
      %183 = vector.extract_strided_slice %176 {offsets = [0, 128], sizes = [8, 128], strides = [1, 1]} : vector<8x512xf32> to vector<8x128xf32>
      %184 = arith.negf %183 : vector<8x128xf32>
      %185 = math.exp %184 : vector<8x128xf32>
      %cst_37 = arith.constant 1.000000e+00 : f32
      %186 = vector.broadcast %cst_37 : f32 to vector<8x128xf32>
      %187 = arith.addf %186, %185 : vector<8x128xf32>
      %188 = arith.divf %186, %187 : vector<8x128xf32>
      %189 = vector.extract_strided_slice %176 {offsets = [0, 256], sizes = [8, 128], strides = [1, 1]} : vector<8x512xf32> to vector<8x128xf32>
      %190 = math.tanh %189 : vector<8x128xf32>
      %191 = vector.extract_strided_slice %176 {offsets = [0, 384], sizes = [8, 128], strides = [1, 1]} : vector<8x512xf32> to vector<8x128xf32>
      %192 = arith.negf %191 : vector<8x128xf32>
      %193 = math.exp %192 : vector<8x128xf32>
      %cst_38 = arith.constant 1.000000e+00 : f32
      %194 = vector.broadcast %cst_38 : f32 to vector<8x128xf32>
      %195 = arith.addf %194, %193 : vector<8x128xf32>
      %196 = arith.divf %194, %195 : vector<8x128xf32>
      %197 = arith.mulf %188, %172 : vector<8x128xf32>
      %198 = arith.mulf %182, %190 : vector<8x128xf32>
      %199 = arith.addf %197, %198 : vector<8x128xf32>
      %200 = math.tanh %199 : vector<8x128xf32>
      %201 = arith.mulf %196, %200 : vector<8x128xf32>
      %c4_i32 = arith.constant 4 : i32
      %202 = arith.addi %18, %c4_i32 : i32
      %203 = vector.broadcast %202 : i32 to vector<8x1xi32>
      %204 = arith.cmpi sgt, %16, %203 : vector<8x1xi32>
      %205 = vector.shape_cast %204 : vector<8x1xi1> to vector<8x1xi1>
      %206 = vector.broadcast %205 : vector<8x1xi1> to vector<8x128xi1>
      %207 = arith.select %206, %201, %169 : vector<8x128xi1>, vector<8x128xf32>
      %208 = vector.shape_cast %204 : vector<8x1xi1> to vector<8x1xi1>
      %209 = vector.broadcast %208 : vector<8x1xi1> to vector<8x128xi1>
      %210 = arith.select %209, %199, %172 : vector<8x128xi1>, vector<8x128xf32>
      %211 = vector.extract_strided_slice %15 {offsets = [40, 0], sizes = [8, 512], strides = [1, 1]} : vector<64x512xf32> to vector<8x512xf32>
      %212 = arith.truncf %207 : vector<8x128xf32> to vector<8x128xbf16>
      %cst_39 = arith.constant dense<0.000000e+00> : vector<8x512xf32>
      %213 = tpu.matmul %212, %17, %cst_39 {dimension_numbers = #tpu.dot_dimension_numbers<[1], [0], [0], [1], [0, 0, 1, 1], [], []>} : vector<8x128xbf16>, vector<128x512xbf16>, vector<8x512xf32> -> vector<8x512xf32>
      %214 = arith.addf %211, %213 : vector<8x512xf32>
      %215 = vector.extract_strided_slice %214 {offsets = [0, 0], sizes = [8, 128], strides = [1, 1]} : vector<8x512xf32> to vector<8x128xf32>
      %216 = arith.negf %215 : vector<8x128xf32>
      %217 = math.exp %216 : vector<8x128xf32>
      %cst_40 = arith.constant 1.000000e+00 : f32
      %218 = vector.broadcast %cst_40 : f32 to vector<8x128xf32>
      %219 = arith.addf %218, %217 : vector<8x128xf32>
      %220 = arith.divf %218, %219 : vector<8x128xf32>
      %221 = vector.extract_strided_slice %214 {offsets = [0, 128], sizes = [8, 128], strides = [1, 1]} : vector<8x512xf32> to vector<8x128xf32>
      %222 = arith.negf %221 : vector<8x128xf32>
      %223 = math.exp %222 : vector<8x128xf32>
      %cst_41 = arith.constant 1.000000e+00 : f32
      %224 = vector.broadcast %cst_41 : f32 to vector<8x128xf32>
      %225 = arith.addf %224, %223 : vector<8x128xf32>
      %226 = arith.divf %224, %225 : vector<8x128xf32>
      %227 = vector.extract_strided_slice %214 {offsets = [0, 256], sizes = [8, 128], strides = [1, 1]} : vector<8x512xf32> to vector<8x128xf32>
      %228 = math.tanh %227 : vector<8x128xf32>
      %229 = vector.extract_strided_slice %214 {offsets = [0, 384], sizes = [8, 128], strides = [1, 1]} : vector<8x512xf32> to vector<8x128xf32>
      %230 = arith.negf %229 : vector<8x128xf32>
      %231 = math.exp %230 : vector<8x128xf32>
      %cst_42 = arith.constant 1.000000e+00 : f32
      %232 = vector.broadcast %cst_42 : f32 to vector<8x128xf32>
      %233 = arith.addf %232, %231 : vector<8x128xf32>
      %234 = arith.divf %232, %233 : vector<8x128xf32>
      %235 = arith.mulf %226, %210 : vector<8x128xf32>
      %236 = arith.mulf %220, %228 : vector<8x128xf32>
      %237 = arith.addf %235, %236 : vector<8x128xf32>
      %238 = math.tanh %237 : vector<8x128xf32>
      %239 = arith.mulf %234, %238 : vector<8x128xf32>
      %c5_i32 = arith.constant 5 : i32
      %240 = arith.addi %18, %c5_i32 : i32
      %241 = vector.broadcast %240 : i32 to vector<8x1xi32>
      %242 = arith.cmpi sgt, %16, %241 : vector<8x1xi32>
      %243 = vector.shape_cast %242 : vector<8x1xi1> to vector<8x1xi1>
      %244 = vector.broadcast %243 : vector<8x1xi1> to vector<8x128xi1>
      %245 = arith.select %244, %239, %207 : vector<8x128xi1>, vector<8x128xf32>
      %246 = vector.shape_cast %242 : vector<8x1xi1> to vector<8x1xi1>
      %247 = vector.broadcast %246 : vector<8x1xi1> to vector<8x128xi1>
      %248 = arith.select %247, %237, %210 : vector<8x128xi1>, vector<8x128xf32>
      %249 = vector.extract_strided_slice %15 {offsets = [48, 0], sizes = [8, 512], strides = [1, 1]} : vector<64x512xf32> to vector<8x512xf32>
      %250 = arith.truncf %245 : vector<8x128xf32> to vector<8x128xbf16>
      %cst_43 = arith.constant dense<0.000000e+00> : vector<8x512xf32>
      %251 = tpu.matmul %250, %17, %cst_43 {dimension_numbers = #tpu.dot_dimension_numbers<[1], [0], [0], [1], [0, 0, 1, 1], [], []>} : vector<8x128xbf16>, vector<128x512xbf16>, vector<8x512xf32> -> vector<8x512xf32>
      %252 = arith.addf %249, %251 : vector<8x512xf32>
      %253 = vector.extract_strided_slice %252 {offsets = [0, 0], sizes = [8, 128], strides = [1, 1]} : vector<8x512xf32> to vector<8x128xf32>
      %254 = arith.negf %253 : vector<8x128xf32>
      %255 = math.exp %254 : vector<8x128xf32>
      %cst_44 = arith.constant 1.000000e+00 : f32
      %256 = vector.broadcast %cst_44 : f32 to vector<8x128xf32>
      %257 = arith.addf %256, %255 : vector<8x128xf32>
      %258 = arith.divf %256, %257 : vector<8x128xf32>
      %259 = vector.extract_strided_slice %252 {offsets = [0, 128], sizes = [8, 128], strides = [1, 1]} : vector<8x512xf32> to vector<8x128xf32>
      %260 = arith.negf %259 : vector<8x128xf32>
      %261 = math.exp %260 : vector<8x128xf32>
      %cst_45 = arith.constant 1.000000e+00 : f32
      %262 = vector.broadcast %cst_45 : f32 to vector<8x128xf32>
      %263 = arith.addf %262, %261 : vector<8x128xf32>
      %264 = arith.divf %262, %263 : vector<8x128xf32>
      %265 = vector.extract_strided_slice %252 {offsets = [0, 256], sizes = [8, 128], strides = [1, 1]} : vector<8x512xf32> to vector<8x128xf32>
      %266 = math.tanh %265 : vector<8x128xf32>
      %267 = vector.extract_strided_slice %252 {offsets = [0, 384], sizes = [8, 128], strides = [1, 1]} : vector<8x512xf32> to vector<8x128xf32>
      %268 = arith.negf %267 : vector<8x128xf32>
      %269 = math.exp %268 : vector<8x128xf32>
      %cst_46 = arith.constant 1.000000e+00 : f32
      %270 = vector.broadcast %cst_46 : f32 to vector<8x128xf32>
      %271 = arith.addf %270, %269 : vector<8x128xf32>
      %272 = arith.divf %270, %271 : vector<8x128xf32>
      %273 = arith.mulf %264, %248 : vector<8x128xf32>
      %274 = arith.mulf %258, %266 : vector<8x128xf32>
      %275 = arith.addf %273, %274 : vector<8x128xf32>
      %276 = math.tanh %275 : vector<8x128xf32>
      %277 = arith.mulf %272, %276 : vector<8x128xf32>
      %c6_i32 = arith.constant 6 : i32
      %278 = arith.addi %18, %c6_i32 : i32
      %279 = vector.broadcast %278 : i32 to vector<8x1xi32>
      %280 = arith.cmpi sgt, %16, %279 : vector<8x1xi32>
      %281 = vector.shape_cast %280 : vector<8x1xi1> to vector<8x1xi1>
      %282 = vector.broadcast %281 : vector<8x1xi1> to vector<8x128xi1>
      %283 = arith.select %282, %277, %245 : vector<8x128xi1>, vector<8x128xf32>
      %284 = vector.shape_cast %280 : vector<8x1xi1> to vector<8x1xi1>
      %285 = vector.broadcast %284 : vector<8x1xi1> to vector<8x128xi1>
      %286 = arith.select %285, %275, %248 : vector<8x128xi1>, vector<8x128xf32>
      %287 = vector.extract_strided_slice %15 {offsets = [56, 0], sizes = [8, 512], strides = [1, 1]} : vector<64x512xf32> to vector<8x512xf32>
      %288 = arith.truncf %283 : vector<8x128xf32> to vector<8x128xbf16>
      %cst_47 = arith.constant dense<0.000000e+00> : vector<8x512xf32>
      %289 = tpu.matmul %288, %17, %cst_47 {dimension_numbers = #tpu.dot_dimension_numbers<[1], [0], [0], [1], [0, 0, 1, 1], [], []>} : vector<8x128xbf16>, vector<128x512xbf16>, vector<8x512xf32> -> vector<8x512xf32>
      %290 = arith.addf %287, %289 : vector<8x512xf32>
      %291 = vector.extract_strided_slice %290 {offsets = [0, 0], sizes = [8, 128], strides = [1, 1]} : vector<8x512xf32> to vector<8x128xf32>
      %292 = arith.negf %291 : vector<8x128xf32>
      %293 = math.exp %292 : vector<8x128xf32>
      %cst_48 = arith.constant 1.000000e+00 : f32
      %294 = vector.broadcast %cst_48 : f32 to vector<8x128xf32>
      %295 = arith.addf %294, %293 : vector<8x128xf32>
      %296 = arith.divf %294, %295 : vector<8x128xf32>
      %297 = vector.extract_strided_slice %290 {offsets = [0, 128], sizes = [8, 128], strides = [1, 1]} : vector<8x512xf32> to vector<8x128xf32>
      %298 = arith.negf %297 : vector<8x128xf32>
      %299 = math.exp %298 : vector<8x128xf32>
      %cst_49 = arith.constant 1.000000e+00 : f32
      %300 = vector.broadcast %cst_49 : f32 to vector<8x128xf32>
      %301 = arith.addf %300, %299 : vector<8x128xf32>
      %302 = arith.divf %300, %301 : vector<8x128xf32>
      %303 = vector.extract_strided_slice %290 {offsets = [0, 256], sizes = [8, 128], strides = [1, 1]} : vector<8x512xf32> to vector<8x128xf32>
      %304 = math.tanh %303 : vector<8x128xf32>
      %305 = vector.extract_strided_slice %290 {offsets = [0, 384], sizes = [8, 128], strides = [1, 1]} : vector<8x512xf32> to vector<8x128xf32>
      %306 = arith.negf %305 : vector<8x128xf32>
      %307 = math.exp %306 : vector<8x128xf32>
      %cst_50 = arith.constant 1.000000e+00 : f32
      %308 = vector.broadcast %cst_50 : f32 to vector<8x128xf32>
      %309 = arith.addf %308, %307 : vector<8x128xf32>
      %310 = arith.divf %308, %309 : vector<8x128xf32>
      %311 = arith.mulf %302, %286 : vector<8x128xf32>
      %312 = arith.mulf %296, %304 : vector<8x128xf32>
      %313 = arith.addf %311, %312 : vector<8x128xf32>
      %314 = math.tanh %313 : vector<8x128xf32>
      %315 = arith.mulf %310, %314 : vector<8x128xf32>
      %c7_i32 = arith.constant 7 : i32
      %316 = arith.addi %18, %c7_i32 : i32
      %317 = vector.broadcast %316 : i32 to vector<8x1xi32>
      %318 = arith.cmpi sgt, %16, %317 : vector<8x1xi32>
      %319 = vector.shape_cast %318 : vector<8x1xi1> to vector<8x1xi1>
      %320 = vector.broadcast %319 : vector<8x1xi1> to vector<8x128xi1>
      %321 = arith.select %320, %315, %283 : vector<8x128xi1>, vector<8x128xf32>
      %322 = vector.shape_cast %318 : vector<8x1xi1> to vector<8x1xi1>
      %323 = vector.broadcast %322 : vector<8x1xi1> to vector<8x128xi1>
      %324 = arith.select %323, %313, %286 : vector<8x128xi1>, vector<8x128xf32>
      %c0_51 = arith.constant 0 : index
      %c0_52 = arith.constant 0 : index
      %325 = vector.load %arg10[%c0_51, %c0_52] : memref<8x128xf32, #tpu.memory_space<vmem>>, vector<8x128xf32>
      tpu.vector_store %arg10[%c0_51, %c0_52], %321 {strides = array<i32>} : memref<8x128xf32, #tpu.memory_space<vmem>>, vector<8x128xf32>,
      %c0_53 = arith.constant 0 : index
      %c0_54 = arith.constant 0 : index
      %326 = vector.load %arg11[%c0_53, %c0_54] : memref<8x128xf32, #tpu.memory_space<vmem>>, vector<8x128xf32>
      tpu.vector_store %arg11[%c0_53, %c0_54], %324 {strides = array<i32>} : memref<8x128xf32, #tpu.memory_space<vmem>>, vector<8x128xf32>,
    } else {
    }
    %c0_i32_2 = arith.constant 0 : i32
    %7 = arith.cmpi eq, %arg0, %c0_i32_2 : i32
    %8 = arith.extui %7 : i1 to i32
    %c0_i32_3 = arith.constant 0 : i32
    %9 = arith.cmpi ne, %8, %c0_i32_3 : i32
    scf.if %9 {
      %c0_4 = arith.constant 0 : index
      %c0_5 = arith.constant 0 : index
      %10 = vector.load %arg10[%c0_4, %c0_5] : memref<8x128xf32, #tpu.memory_space<vmem>>, vector<8x128xf32>
      %11 = arith.truncf %10 : vector<8x128xf32> to vector<8x128xbf16>
      %c0_6 = arith.constant 0 : index
      %c0_7 = arith.constant 0 : index
      %12 = vector.load %arg7[%c0_6, %c0_7] : memref<128x128xbf16, #tpu.memory_space<vmem>>, vector<128x128xbf16>
      %cst = arith.constant dense<0.000000e+00> : vector<8x128xf32>
      %13 = tpu.matmul %11, %12, %cst {dimension_numbers = #tpu.dot_dimension_numbers<[1], [0], [0], [1], [0, 0, 1, 1], [], []>} : vector<8x128xbf16>, vector<128x128xbf16>, vector<8x128xf32> -> vector<8x128xf32>
      %c0_8 = arith.constant 0 : index
      %c0_9 = arith.constant 0 : index
      %14 = vector.load %arg8[%c0_8, %c0_9] : memref<1x128xf32, #tpu.memory_space<vmem>>, vector<1x128xf32>
      %15 = vector.broadcast %14 : vector<1x128xf32> to vector<8x128xf32>
      %16 = arith.addf %13, %15 : vector<8x128xf32>
      %c0_10 = arith.constant 0 : index
      %c0_11 = arith.constant 0 : index
      %17 = vector.load %arg9[%c0_10, %c0_11] : memref<8x128xf32, #tpu.memory_space<vmem>>, vector<8x128xf32>
      tpu.vector_store %arg9[%c0_10, %c0_11], %16 {strides = array<i32>} : memref<8x128xf32, #tpu.memory_space<vmem>>, vector<8x128xf32>,
    } else {
    }
    return
  }
  func.func @transform_0(%arg0: i32, %arg1: memref<1xi32, #tpu.memory_space<smem>>) -> (i32, i32) {
    %c0_i32 = arith.constant 0 : i32
    %c0_i32_0 = arith.constant 0 : i32
    %c0_i32_1 = arith.constant 0 : i32
    return %c0_i32, %c0_i32_0 : i32, i32
  }
  func.func @transform_1(%arg0: i32, %arg1: memref<1xi32, #tpu.memory_space<smem>>) -> (i32, i32) {
    %c0 = arith.constant 0 : index
    %0 = memref.load %arg1[%c0] : memref<1xi32, #tpu.memory_space<smem>>
    %c1_i32 = arith.constant 1 : i32
    %1 = arith.subi %0, %c1_i32 : i32
    %2 = arith.minsi %arg0, %1 : i32
    %c0_i32 = arith.constant 0 : i32
    %c0_i32_0 = arith.constant 0 : i32
    return %2, %c0_i32 : i32, i32
  }
  func.func @transform_2(%arg0: i32, %arg1: memref<1xi32, #tpu.memory_space<smem>>) -> (i32, i32) {
    %c0_i32 = arith.constant 0 : i32
    %c0_i32_0 = arith.constant 0 : i32
    %c0_i32_1 = arith.constant 0 : i32
    return %c0_i32, %c0_i32_0 : i32, i32
  }
  func.func @transform_3(%arg0: i32, %arg1: memref<1xi32, #tpu.memory_space<smem>>) -> (i32, i32) {
    %c0_i32 = arith.constant 0 : i32
    %c0_i32_0 = arith.constant 0 : i32
    %c0_i32_1 = arith.constant 0 : i32
    return %c0_i32, %c0_i32_0 : i32, i32
  }
  func.func @transform_4(%arg0: i32, %arg1: memref<1xi32, #tpu.memory_space<smem>>) -> (i32, i32) {
    %c0_i32 = arith.constant 0 : i32
    %c0_i32_0 = arith.constant 0 : i32
    %c0_i32_1 = arith.constant 0 : i32
    return %c0_i32, %c0_i32_0 : i32, i32
  }
  func.func @transform_5(%arg0: i32, %arg1: memref<1xi32, #tpu.memory_space<smem>>) -> (i32, i32) {
    %c0_i32 = arith.constant 0 : i32
    %c0_i32_0 = arith.constant 0 : i32
    %c0_i32_1 = arith.constant 0 : i32
    return %c0_i32, %c0_i32_0 : i32, i32
  }
  func.func @transform_6(%arg0: i32, %arg1: memref<1xi32, #tpu.memory_space<smem>>) -> (i32, i32) {
    %c0_i32 = arith.constant 0 : i32
    %c0_i32_0 = arith.constant 0 : i32
    %c0_i32_1 = arith.constant 0 : i32
    return %c0_i32, %c0_i32_0 : i32, i32
  }
  func.func @transform_7(%arg0: i32, %arg1: memref<1xi32, #tpu.memory_space<smem>>) -> (i32, i32) {
    %c0_i32 = arith.constant 0 : i32
    %c0_i32_0 = arith.constant 0 : i32
    %c0_i32_1 = arith.constant 0 : i32
    return %c0_i32, %c0_i32_0 : i32, i32
  }
}

</mosaic_0001>

<bundles_post_ra>
// kernel: tpu_custom_call.1
= control target key start
LH: loop header
LB: loop body
LE: loop exit
PB: predicated region body
PF: predicated region fallthrough
CT: control target
= control target key end

     0   :  { %14 = vsyncpa [#allocation7], 0  ;;  %s2827_s0 = inlined_call_operand.<no memory space> [shape: s32[1], index: 0, kind: input, shape index: {}]   ;;  %s2828_s1 = inlined_call_operand.vmem [shape: s32[8,1], index: 1, kind: input, shape index: {}]   ;;  %s2829_s2 = inlined_call_operand.vmem [shape: bf16[64,32], index: 2, kind: input, shape index: {}]   ;;  %s2830_s3 = inlined_call_operand.hbm [shape: bf16[32,512], index: 3, kind: input, shape index: {}]   ;;  %s2831_s4 = inlined_call_operand.hbm [shape: bf16[128,512], index: 4, kind: input, shape index: {}]   ;;  %s2832_s5 = inlined_call_operand.vmem [shape: f32[1,512], index: 5, kind: input, shape index: {}]   ;;  %s2833_s6 = inlined_call_operand.vmem [shape: bf16[128,128], index: 6, kind: input, shape index: {}]   ;;  %s2834_s7 = inlined_call_operand.vmem [shape: f32[1,128], index: 7, kind: input, shape index: {}]   ;;  %s2835_s8 = inlined_call_operand.hbm [shape: f32[8,128], index: 8, kind: output, shape index: {}]  }
   0x1   :  { %15 = vsyncpa [#allocation10], 0 }
   0x2   :  { %16 = vsyncpa [#allocation8], 0  ;;  %s2095_s27 = smov [#allocation6]  }
   0x3   :  { %s40_s28 = sshll.u32 %s2095_s27, 4  ;;  %s41_s28 = int_to_ptr.vmem [resolvable:$true] %s40_s28 }
   0x4   :  { %s2037_s29 = scalar_lea.vmem %s41_s28, 1024  ;;  %p2042_p1 = scmp.lt.s32.totalorder %s41_s28, %s41_s28 }
   0x5   :  { %p2038_p0 = scmp.ne.s32.totalorder %s41_s28, %s2037_s29  ;;  %p2043_p2 = scmp.lt.s32.totalorder %s2037_s29, %s2037_s29 }
   0x7   :  { %p2044_p3 = por %p2043_p2, %p2042_p1 }
   0x9   :  { %p2045_p4 = pnand %p2044_p3, %p2038_p0 }
   0xb   :  { %2048 = shalt.err (!%p2045_p4)
}
   0xc   :  { %s2096_s30 = smov 256   ;;  %s2097_s9 = smov 16  }
   0xd   :  { %46 = dma.hbm_to_vmem [thread:$0]  %s2830_s3, 1024, %s41_s28, [#allocation7], %s2096_s30, %s2096_s30, %s2097_s9  }
   0xe   :  { %s2098_s12 = smov [#allocation9]  }
   0xf   :  { %s52_s13 = sshll.u32 %s2098_s12, 4  ;;  %s53_s13 = int_to_ptr.vmem [resolvable:$true] %s52_s13 }
  0x10   :  { %s2057_s14 = scalar_lea.vmem %s53_s13, 4096  ;;  %p2062_p6 = scmp.lt.s32.totalorder %s53_s13, %s53_s13 }
  0x11   :  { %p2058_p5 = scmp.ne.s32.totalorder %s53_s13, %s2057_s14  ;;  %p2063_p7 = scmp.lt.s32.totalorder %s2057_s14, %s2057_s14 }
  0x13   :  { %p2064_p8 = por %p2063_p7, %p2062_p6 }
  0x15   :  { %p2065_p9 = pnand %p2064_p8, %p2058_p5 }
  0x17   :  { %2068 = shalt.err (!%p2065_p9)
}
  0x18   :  { %58 = dma.hbm_to_vmem [thread:$0]  %s2831_s4, 4096, %s53_s13, [#allocation10], %s2096_s30, %s2096_s30, %s2097_s9  }
  0x19   :  { %2089 = dma.done.wait [#allocation7], 1024  }
  0x1a   :  { %2090 = vsyncadd [#allocation7], 4294966272 }
  0x1b   :  { %2091 = dma.done.wait [#allocation10], 4096  }
  0x1c   :  { %2092 = vsyncadd [#allocation10], 4294963200  ;;  %s1667_s18 = sadd.s32 4294967295, %s2827_s0  ;;  %v2836_v0 = vmov 0.0   ;;  %p1672_p12 = scmp.le.s32.totalorder %s2827_s0, 0 }
  0x1d   :  { %p1668_p10 = scmp.gt.s32.totalorder %s1667_s18, 0  ;;  %99 = vst [vmem:[#allocation2] sm:$0xff] %v2836_v0  ;;  %100 = vst [vmem:[#allocation3] sm:$0xff] %v2836_v0 }
  0x1f   :  { %s2885_s18 = smov (%p1668_p10, %s1667_s18), 0 }
  0x20   :  { %s1669_s19 = sshll.u32 %s2885_s18, 3 }
  0x21   :  { %p85_p11 = scmp.lt.s32.totalorder %s1669_s19, 7  ;;  %105 = sbr.rel (%p1672_p12) target bundleno = 2096 (0x830), region = 45 }
  0x23   :  { %s2887_s19 = smov (!%p85_p11, %s1669_s19), 7 }
  0x24   :  { %s1670_s20 = sshll.u32 %s2887_s19, 2 }
  0x25   :  { %s2162_s22 = scalar_lea.vmem %s2829_s2, %s1670_s20 }
  0x26   :  { %v1797_v1 = vld [vmem:[#allocation6 + $0x24] ss:$16 sps:$4 sm:$0xff]   ;;  %v1799_v2 = vld [vmem:[#allocation6 + $0x2c] ss:$16 sps:$4 sm:$0xff]   ;;  %v2838_v3 = vmov 0   ;;  %vm204_vm0 = vcmask 261120   ;;  %v124_v53 = vlaneseq }
  0x27   :  { %249 = vmatprep.mubr.bf16.mxu0 %v2838_v3  ;;  %322 = vmatprep.mubr.bf16.mxu1 %v2838_v3  ;;  %v1801_v4 = vld [vmem:[#allocation6 + $0x20] ss:$16 sps:$4 sm:$0xff]   ;;  %v1802_v5 = vld [vmem:[#allocation6 + $0x28] ss:$16 sps:$4 sm:$0xff]   ;;  %v1803_v6 = vld [vmem:[#allocation6 + $0x4] ss:$16 sps:$4 sm:$0xff]  }
  0x28   :  { %229 = vmatprep.subr.bf16.mxu0 %v1797_v1  ;;  %1795 = vset.pattern.permute.xlu0 %v2838_v3  ;;  %v1805_v7 = vld [vmem:[#allocation6 + $0xc] ss:$16 sps:$4 sm:$0xff]   ;;  %v1807_v8 = vld [vmem:[#allocation6] ss:$16 sps:$4 sm:$0xff]   ;;  %v1808_v9 = vld [vmem:[#allocation6 + $0x8] ss:$16 sps:$4 sm:$0xff]  }
  0x29   :  { %302 = vmatprep.subr.bf16.mxu1 %v1799_v2  ;;  %1796 = vset.pattern.permute.xlu1 %v2838_v3  ;;  %v1809_v10 = vld [vmem:[%s2162_s22] sm:$0xff]   ;;  %v2174_v12 = vld [vmem:[#allocation9 + $0xec] ss:$16 sps:$4 sm:$0xff]   ;;  %v2178_v14 = vld [vmem:[#allocation9 + $0xe8] ss:$16 sps:$4 sm:$0xff]   ;;  %v125_v54 = vshrl.u32 %v124_v53, 7 }
  0x2a   :  { %230 = vmatpush1.bf16.msra.mxu0 %v1801_v4  ;;  %303 = vmatpush1.bf16.msra.mxu1 %v1802_v5  ;;  %v2172_v11 = vld [vmem:[#allocation9 + $0xe4] ss:$16 sps:$4 sm:$0xff]   ;;  %v2176_v13 = vld [vmem:[#allocation9 + $0xe0] ss:$16 sps:$4 sm:$0xff]   ;;  %v2184_v16 = vld [vmem:[#allocation9 + $0xcc] ss:$16 sps:$4 sm:$0xff]  }
  0x2b   :  { %231 = vmatprep.subr.bf16.mxu0 %v1803_v6  ;;  %304 = vmatprep.subr.bf16.mxu1 %v1805_v7  ;;  %v2181_v15 = vld [vmem:[#allocation9 + $0xc4] ss:$16 sps:$4 sm:$0xff]   ;;  %v2188_v17 = vld [vmem:[#allocation9 + $0xc0] ss:$16 sps:$4 sm:$0xff]   ;;  %v2192_v18 = vld [vmem:[#allocation9 + $0xc8] ss:$16 sps:$4 sm:$0xff]  }
  0x2c   :  { %v2196_v19 = vld [vmem:[#allocation9 + $0xa4] ss:$16 sps:$4 sm:$0xff]   ;;  %v1822_v20 = vld [vmem:[%s2162_s22 + $0x8] sm:$0xff]   ;;  %v2203_v22 = vld [vmem:[#allocation9 + $0xa0] ss:$16 sps:$4 sm:$0xff]   ;;  %v134_v55 = vsub.s32 2, %v125_v54 }
  0x2d   :  { %v2201_v21 = vld [vmem:[#allocation9 + $0xac] ss:$16 sps:$4 sm:$0xff]   ;;  %v2207_v23 = vld [vmem:[#allocation9 + $0xa8] ss:$16 sps:$4 sm:$0xff]   ;;  %v2211_v24 = vld [vmem:[#allocation9 + $0x84] ss:$16 sps:$4 sm:$0xff]  }
  0x2e   :  { %232 = vmatpush1.bf16.msra.mxu0 %v1807_v8  ;;  %305 = vmatpush1.bf16.msra.mxu1 %v1808_v9  ;;  %v2213_v25 = vld [vmem:[#allocation9 + $0x8c] ss:$16 sps:$4 sm:$0xff]   ;;  %v2217_v26 = vld [vmem:[#allocation9 + $0x80] ss:$16 sps:$4 sm:$0xff]   ;;  %v2221_v27 = vld [vmem:[#allocation9 + $0x88] ss:$16 sps:$4 sm:$0xff]  }
  0x2f   :  { %560 = vmatprep.subr.bf16.mxu0 %v2172_v11  ;;  %601 = vmatprep.subr.bf16.mxu1 %v2174_v12  ;;  %v2225_v28 = vld [vmem:[#allocation9 + $0x64] ss:$16 sps:$4 sm:$0xff]   ;;  %v2227_v29 = vld [vmem:[#allocation9 + $0x6c] ss:$16 sps:$4 sm:$0xff]   ;;  %v2232_v31 = vld [vmem:[#allocation9 + $0x60] ss:$16 sps:$4 sm:$0xff]  }
  0x30   :  { %v1835_v30 = vld [vmem:[%s2162_s22 + $0x10] sm:$0xff]   ;;  %v2234_v32 = vld [vmem:[#allocation9 + $0x68] ss:$16 sps:$4 sm:$0xff]   ;;  %v2242_v34 = vld [vmem:[#allocation9 + $0x4c] ss:$16 sps:$4 sm:$0xff]   ;;  %v126_v56 = vsub.s32 0, %v125_v54 }
  0x31   :  { %1685 = vmatmul.mubr.msk.bf16.vlgmr.msra.gmra.mxu0 %vm204_vm0, %v1809_v10  ;;  %1689 = vmatmul.mubr.msk.bf16.vlgmr.msra.gmra.mxu1 %vm204_vm0, %v1809_v10  ;;  %v2238_v33 = vld [vmem:[#allocation9 + $0x44] ss:$16 sps:$4 sm:$0xff]   ;;  %v2246_v35 = vld [vmem:[#allocation9 + $0x40] ss:$16 sps:$4 sm:$0xff]   ;;  %v2248_v36 = vld [vmem:[#allocation9 + $0x48] ss:$16 sps:$4 sm:$0xff]  }
  0x32   :  { %561 = vmatpush1.bf16.msra.mxu0 %v2176_v13  ;;  %602 = vmatpush1.bf16.msra.mxu1 %v2178_v14  ;;  %v2252_v37 = vld [vmem:[#allocation9 + $0x24] ss:$16 sps:$4 sm:$0xff]   ;;  %v2256_v38 = vld [vmem:[#allocation9 + $0x2c] ss:$16 sps:$4 sm:$0xff]   ;;  %v2268_v41 = vld [vmem:[#allocation9 + $0x20] ss:$16 sps:$4 sm:$0xff]  }
  0x33   :  { %562 = vmatprep.subr.bf16.mxu0 %v2181_v15  ;;  %603 = vmatprep.subr.bf16.mxu1 %v2184_v16  ;;  %v1848_v39 = vld [vmem:[%s2162_s22 + $0x18] sm:$0xff]   ;;  %v2264_v40 = vld [vmem:[%s2828_s1] sm:$0xff]  ;;  %v138_v57 = vsub.s32 3, %v125_v54  ;;  %v130_v62 = vsub.s32 1, %v125_v54 }
  0x34   :  { %259 = vmatprep.mubr.bf16.mxu0 %v2838_v3  ;;  %332 = vmatprep.mubr.bf16.mxu1 %v2838_v3  ;;  %v2270_v42 = vld [vmem:[#allocation9 + $0x28] ss:$16 sps:$4 sm:$0xff]   ;;  %vm671_vm1 = vcmp.gt.s32.totalorder %v2264_v40, 0  ;;  %v2275_v43 = vld [vmem:[#allocation9 + $0x4] ss:$16 sps:$4 sm:$0xff]   ;;  %vm792_vm2 = vcmp.gt.s32.totalorder %v2264_v40, 1 }
  0x35   :  { %v2277_v44 = vld [vmem:[#allocation9 + $0xc] ss:$16 sps:$4 sm:$0xff]   ;;  %v672_v45 = vsel %vm671_vm1, 1, %v2838_v3  ;;  %v2285_v46 = vld [vmem:[#allocation9] ss:$16 sps:$4 sm:$0xff]   ;;  %v793_v49 = vsel %vm792_vm2, 1, %v2838_v3 }
  0x36   :  { %563 = vmatpush1.bf16.msra.mxu0 %v2188_v17  ;;  %604 = vmatpush1.bf16.msra.mxu1 %v2192_v18  ;;  %v2287_v47 = vld [vmem:[#allocation9 + $0x8] ss:$16 sps:$4 sm:$0xff]   ;;  %v2289_v48 = vld [vmem:[#allocation2] sm:$0xff]  ;;  %vm1155_vm3 = vcmp.gt.s32.totalorder %v2264_v40, 4  ;;  %vm1397_vm4 = vcmp.gt.s32.totalorder %v2264_v40, 6  ;;  %vm913_vm6 = vcmp.gt.s32.totalorder %v2264_v40, 2 }
  0x37   :  { %564 = vmatprep.subr.bf16.mxu0 %v2196_v19  ;;  %605 = vmatprep.subr.bf16.mxu1 %v2201_v21  ;;  %v399_v50 = vpack.c.bf16 %v2289_v48, %v2289_v48  ;;  %v1156_v51 = vsel %vm1155_vm3, 1, %v2838_v3  ;;  %v1398_v52 = vsel %vm1397_vm4, 1, %v2838_v3  ;;  %v122_v58 = vld [vmem:[%s2832_s5] sm:$0xf]  ;;  %vm1034_vm7 = vcmp.gt.s32.totalorder %v2264_v40, 3 }
  0x38   :  { %674 = vperm.xlu0 %1795, %v672_v45   ;;  %v2347_v61 = vrot.slane %v122_v58, %v134_v55  ;;  %v127_v2 = vrot.slane %v122_v58, %v126_v56  ;;  %v2353_v4 = vrot.slane %v122_v58, %v138_v57  ;;  %v131_v7 = vrot.slane %v122_v58, %v130_v62 }
  0x39   :  { %1686 = vmatmul.mubr.msk.bf16.gmra.mxu0 %vm204_vm0, %v1822_v20  ;;  %1690 = vmatmul.mubr.msk.bf16.gmra.mxu1 %vm204_vm0, %v1822_v20  ;;  %vm1276_vm8 = vcmp.gt.s32.totalorder %v2264_v40, 5  ;;  %vm1518_vm9 = vcmp.gt.s32.totalorder %v2264_v40, 7 }
  0x3a   :  { %565 = vmatpush1.bf16.msra.mxu0 %v2203_v22  ;;  %606 = vmatpush1.bf16.msra.mxu1 %v2207_v23 }
  0x3b   :  { %566 = vmatprep.subr.bf16.mxu0 %v2211_v24  ;;  %607 = vmatprep.subr.bf16.mxu1 %v2213_v25 }
  0x3c   :  { %269 = vmatprep.mubr.bf16.mxu0 %v2838_v3  ;;  %342 = vmatprep.mubr.bf16.mxu1 %v2838_v3 }
  0x3d   :  { %795 = vperm.xlu0 %1795, %v793_v49  }
  0x3e   :  { %567 = vmatpush1.bf16.msra.mxu0 %v2217_v26  ;;  %608 = vmatpush1.bf16.msra.mxu1 %v2221_v27 }
  0x3f   :  { %568 = vmatprep.subr.bf16.mxu0 %v2225_v28  ;;  %609 = vmatprep.subr.bf16.mxu1 %v2227_v29 }
  0x41   :  { %1687 = vmatmul.mubr.msk.bf16.gmra.mxu0 %vm204_vm0, %v1835_v30  ;;  %1691 = vmatmul.mubr.msk.bf16.gmra.mxu1 %vm204_vm0, %v1835_v30 }
  0x42   :  { %569 = vmatpush1.bf16.msra.mxu0 %v2232_v31  ;;  %610 = vmatpush1.bf16.msra.mxu1 %v2234_v32 }
  0x43   :  { %570 = vmatprep.subr.bf16.mxu0 %v2238_v33  ;;  %611 = vmatprep.subr.bf16.mxu1 %v2242_v34 }
  0x44   :  { %279 = vmatprep.mubr.bf16.mxu0 %v2838_v3  ;;  %352 = vmatprep.mubr.bf16.mxu1 %v2838_v3 }
  0x45   :  { %1158 = vperm.xlu0 %1795, %v1156_v51  }
  0x46   :  { %571 = vmatpush1.bf16.msra.mxu0 %v2246_v35  ;;  %612 = vmatpush1.bf16.msra.mxu1 %v2248_v36 }
  0x47   :  { %572 = vmatprep.subr.bf16.mxu0 %v2252_v37  ;;  %613 = vmatprep.subr.bf16.mxu1 %v2256_v38 }
  0x49   :  { %1688 = vmatmul.mubr.msk.bf16.gmra.mxu0 %vm204_vm0, %v1848_v39  ;;  %1692 = vmatmul.mubr.msk.bf16.gmra.mxu1 %vm204_vm0, %v1848_v39 }
  0x4a   :  { %573 = vmatpush1.bf16.msra.mxu0 %v2268_v41  ;;  %614 = vmatpush1.bf16.msra.mxu1 %v2270_v42 }
  0x4b   :  { %574 = vmatprep.subr.bf16.mxu0 %v2275_v43  ;;  %615 = vmatprep.subr.bf16.mxu1 %v2277_v44 }
  0x4c   :  { %592 = vmatprep.mubr.bf16.mxu0 %v2838_v3  ;;  %633 = vmatprep.mubr.bf16.mxu1 %v2838_v3 }
  0x4d   :  { %1400 = vperm.xlu0 %1795, %v1398_v52  }
  0x4e   :  { %575 = vmatpush1.bf16.msra.mxu0 %v2285_v46  ;;  %616 = vmatpush1.bf16.msra.mxu1 %v2287_v47 }
  0x4f   :  { %680 = vmatprep.subr.bf16.mxu0 %v2172_v11  ;;  %721 = vmatprep.subr.bf16.mxu1 %v2174_v12 }
  0x51   :  { %593 = vmatmul.mubr.bf16.vlgmr.msra.gmra.mxu0 %v399_v50  ;;  %634 = vmatmul.mubr.bf16.vlgmr.msra.gmra.mxu1 %v399_v50 }
  0x52   :  { %681 = vmatpush1.bf16.msra.mxu0 %v2176_v13  ;;  %722 = vmatpush1.bf16.msra.mxu1 %v2178_v14 }
  0x53   :  { %682 = vmatprep.subr.bf16.mxu0 %v2181_v15  ;;  %723 = vmatprep.subr.bf16.mxu1 %v2184_v16 }
  0x54   :  { %712 = vmatprep.mubr.bf16.mxu0 %v2838_v3  ;;  %753 = vmatprep.mubr.bf16.mxu1 %v2838_v3 }
  0x56   :  { %683 = vmatpush1.bf16.msra.mxu0 %v2188_v17  ;;  %724 = vmatpush1.bf16.msra.mxu1 %v2192_v18 }
  0x57   :  { %684 = vmatprep.subr.bf16.mxu0 %v2196_v19  ;;  %725 = vmatprep.subr.bf16.mxu1 %v2201_v21 }
  0x5a   :  { %685 = vmatpush1.bf16.msra.mxu0 %v2203_v22  ;;  %726 = vmatpush1.bf16.msra.mxu1 %v2207_v23 }
  0x5b   :  { %686 = vmatprep.subr.bf16.mxu0 %v2211_v24  ;;  %727 = vmatprep.subr.bf16.mxu1 %v2213_v25 }
  0x5e   :  { %687 = vmatpush1.bf16.msra.mxu0 %v2217_v26  ;;  %728 = vmatpush1.bf16.msra.mxu1 %v2221_v27 }
  0x5f   :  { %688 = vmatprep.subr.bf16.mxu0 %v2225_v28  ;;  %729 = vmatprep.subr.bf16.mxu1 %v2227_v29 }
  0x62   :  { %689 = vmatpush1.bf16.msra.mxu0 %v2232_v31  ;;  %730 = vmatpush1.bf16.msra.mxu1 %v2234_v32 }
  0x63   :  { %690 = vmatprep.subr.bf16.mxu0 %v2238_v33  ;;  %731 = vmatprep.subr.bf16.mxu1 %v2242_v34 }
  0x66   :  { %691 = vmatpush1.bf16.msra.mxu0 %v2246_v35  ;;  %732 = vmatpush1.bf16.msra.mxu1 %v2248_v36 }
  0x67   :  { %692 = vmatprep.subr.bf16.mxu0 %v2252_v37  ;;  %733 = vmatprep.subr.bf16.mxu1 %v2256_v38 }
  0x6a   :  { %693 = vmatpush1.bf16.msra.mxu0 %v2268_v41  ;;  %734 = vmatpush1.bf16.msra.mxu1 %v2270_v42 }
  0x6b   :  { %694 = vmatprep.subr.bf16.mxu0 %v2275_v43  ;;  %735 = vmatprep.subr.bf16.mxu1 %v2277_v44 }
  0x6e   :  { %695 = vmatpush1.bf16.msra.mxu0 %v2285_v46  ;;  %736 = vmatpush1.bf16.msra.mxu1 %v2287_v47 }
  0x6f   :  { %801 = vmatprep.subr.bf16.mxu0 %v2172_v11  ;;  %842 = vmatprep.subr.bf16.mxu1 %v2174_v12 }
  0xf1   :  { %v2343_v59 = vpop.f32.mrf.mxu0  ;;  %v2345_v60 = vpop.f32.mrf.mxu1 }
  0xf3   :  { %v2349_v63 = vpop.f32.mrf.mxu0  ;;  %v2351_v1 = vpop.f32.mrf.mxu1 }
  0xf5   :  { %v255_v5 = vpop.f32.mrf.mxu0  ;;  %v328_v6 = vpop.f32.mrf.mxu1 }
  0xf6   :  { %v2355_v8 = vadd.f32 %v255_v5, %v127_v2  ;;  %v2358_v9 = vadd.f32 %v328_v6, %v2347_v61 }
  0xf7   :  { %v257_v10 = vpop.f32.mrf.mxu0  ;;  %v330_v20 = vpop.f32.mrf.mxu1 }
  0xf8   :  { %v2360_v30 = vadd.f32 %v257_v10, %v131_v7  ;;  %v2363_v39 = vadd.f32 %v330_v20, %v2353_v4 }
  0xf9   :  { %v261_v45 = vpop.f32.mrf.mxu0  ;;  %v334_v49 = vpop.f32.mrf.mxu1 }
  0xfa   :  { %v2365_v50 = vadd.f32 %v261_v45, %v127_v2  ;;  %v2368_v51 = vadd.f32 %v334_v49, %v2347_v61 }
  0xfb   :  { %v263_v52 = vpop.f32.mrf.mxu0  ;;  %v336_v53 = vpop.f32.mrf.mxu1 }
  0xfc   :  { %2840 = vst [vmem:[#allocation15_spill] sm:$0xff] %v2368_v51  ;;  %v2370_v54 = vadd.f32 %v263_v52, %v131_v7  ;;  %v2373_v55 = vadd.f32 %v336_v53, %v2353_v4 }
  0xfd   :  { %v265_v56 = vpop.f32.mrf.mxu0  ;;  %v338_v57 = vpop.f32.mrf.mxu1 }
  0xfe   :  { %2841 = vst [vmem:[#allocation16_spill] sm:$0xff] %v2370_v54  ;;  %2842 = vst [vmem:[#allocation17_spill] sm:$0xff] %v2373_v55  ;;  %v2375_v58 = vadd.f32 %v265_v56, %v127_v2  ;;  %v2378_v62 = vadd.f32 %v338_v57, %v2347_v61 }
  0xff   :  { %v267_v5 = vpop.f32.mrf.mxu0  ;;  %v340_v6 = vpop.f32.mrf.mxu1 }
 0x100   :  { %2843 = vst [vmem:[#allocation18_spill] sm:$0xff] %v2375_v58  ;;  %2844 = vst [vmem:[#allocation19_spill] sm:$0xff] %v2378_v62  ;;  %v2380_v10 = vadd.f32 %v267_v5, %v131_v7  ;;  %v2383_v20 = vadd.f32 %v340_v6, %v2353_v4 }
 0x101   :  { %v271_v45 = vpop.f32.mrf.mxu0  ;;  %v344_v49 = vpop.f32.mrf.mxu1 }
 0x102   :  { %2845 = vst [vmem:[#allocation20_spill] sm:$0xff] %v2380_v10  ;;  %2846 = vst [vmem:[#allocation21_spill] sm:$0xff] %v2383_v20  ;;  %v2385_v52 = vadd.f32 %v271_v45, %v127_v2  ;;  %v2388_v53 = vadd.f32 %v344_v49, %v2347_v61 }
 0x103   :  { %v273_v0 = vpop.f32.mrf.mxu0  ;;  %v346_v56 = vpop.f32.mrf.mxu1 }
 0x104   :  { %2847 = vst [vmem:[#allocation22_spill] sm:$0xff] %v2385_v52  ;;  %2848 = vst [vmem:[#allocation23_spill] sm:$0xff] %v2388_v53  ;;  %v2390_v3 = vadd.f32 %v273_v0, %v131_v7  ;;  %v2393_v57 = vadd.f32 %v346_v56, %v2353_v4 }
 0x105   :  { %v275_v62 = vpop.f32.mrf.mxu0  ;;  %v348_v5 = vpop.f32.mrf.mxu1 }
 0x106   :  { %2849 = vst [vmem:[#allocation24_spill] sm:$0xff] %v2390_v3  ;;  %2850 = vst [vmem:[#allocation25_spill] sm:$0xff] %v2393_v57  ;;  %v2395_v10 = vadd.f32 %v275_v62, %v127_v2  ;;  %v2398_v6 = vadd.f32 %v348_v5, %v2347_v61 }
 0x107   :  { %v277_v20 = vpop.f32.mrf.mxu0  ;;  %v350_v45 = vpop.f32.mrf.mxu1 }
 0x108   :  { %2851 = vst [vmem:[#allocation26_spill] sm:$0xff] %v2395_v10  ;;  %2852 = vst [vmem:[#allocation27_spill] sm:$0xff] %v2398_v6  ;;  %v2400_v52 = vadd.f32 %v277_v20, %v131_v7  ;;  %v2403_v49 = vadd.f32 %v350_v45, %v2353_v4 }
 0x109   :  { %v281_v53 = vpop.f32.mrf.mxu0  ;;  %v354_v0 = vpop.f32.mrf.mxu1 }
 0x10a   :  { %2853 = vst [vmem:[#allocation28_spill] sm:$0xff] %v2400_v52  ;;  %2854 = vst [vmem:[#allocation29_spill] sm:$0xff] %v2403_v49  ;;  %v2405_v3 = vadd.f32 %v281_v53, %v127_v2  ;;  %v2408_v56 = vadd.f32 %v354_v0, %v2347_v61 }
 0x10b   :  { %v283_v57 = vpop.f32.mrf.mxu0  ;;  %v356_v62 = vpop.f32.mrf.mxu1 }
 0x10c   :  { %2855 = vst [vmem:[#allocation30_spill] sm:$0xff] %v2405_v3  ;;  %2856 = vst [vmem:[#allocation31_spill] sm:$0xff] %v2408_v56  ;;  %v2410_v10 = vadd.f32 %v283_v57, %v131_v7  ;;  %v2413_v5 = vadd.f32 %v356_v62, %v2353_v4  ;;  %v252_v3 = vadd.f32 %v2343_v59, %v127_v2 }
 0x10d   :  { %v285_v6 = vpop.f32.mrf.mxu0  ;;  %v358_v20 = vpop.f32.mrf.mxu1  ;;  %v254_v62 = vadd.f32 %v2349_v63, %v131_v7 }
 0x10e   :  { %2857 = vst [vmem:[#allocation32_spill] sm:$0xff] %v2410_v10  ;;  %2858 = vst [vmem:[#allocation33_spill] sm:$0xff] %v2413_v5  ;;  %v2415_v52 = vadd.f32 %v285_v6, %v127_v2  ;;  %v2418_v45 = vadd.f32 %v358_v20, %v2347_v61  ;;  %v327_v2 = vadd.f32 %v2351_v1, %v2353_v4 }
 0x10f   :  { %v287_v49 = vpop.f32.mrf.mxu0  ;;  %v360_v53 = vpop.f32.mrf.mxu1 }
 0x110   :  { %2859 = vst [vmem:[#allocation34_spill] sm:$0xff] %v2415_v52  ;;  %2860 = vst [vmem:[#allocation35_spill] sm:$0xff] %v2418_v45  ;;  %v2421_v0 = vadd.f32 %v287_v49, %v131_v7  ;;  %v2424_v56 = vadd.f32 %v360_v53, %v2353_v4  ;;  %v325_v53 = vadd.f32 %v2345_v60, %v2347_v61 }
 0x111   :  { %v594_v57 = vpop.f32.mrf.mxu0  ;;  %v635_v10 = vpop.f32.mrf.mxu1 }
 0x112   :  { %v642_v5 = vadd.f32 %v594_v57, %v252_v3  ;;  %v644_v7 = vadd.f32 %v635_v10, %v325_v53  ;;  %v2861_v53 = vmov 0  }
 0x113   :  { %v596_v58 = vpop.f32.mrf.mxu0  ;;  %v637_v6 = vpop.f32.mrf.mxu1 }
 0x114   :  { %v1725_v52 = vmul.f32 -1.442695, %v642_v5  ;;  %v643_v51 = vadd.f32 %v596_v58, %v254_v62  ;;  %v645_v49 = vadd.f32 %v637_v6, %v327_v2 }
 0x115   :  { %v598_v20 = vpop.f32.mrf.mxu0  ;;  %v639_v45 = vpop.f32.mrf.mxu1 }
 0x116   :  { %1861 = vpow2.f32 %v1725_v52  ;;  %v1726_v55 = vmul.f32 -1.442695, %v643_v51  ;;  %v1727_v63 = vmul.f32 -1.442695, %v645_v49  ;;  %v675_v45 = vpop.permute.xlu0 %674 }
 0x117   :  { %v599_v54 = vpop.f32.mrf.mxu0  ;;  %v640_v59 = vpop.f32.mrf.mxu1  ;;  %vm676_vm5 = vcmp.eq.s32.totalorder %v675_v45, 1 }
 0x118   :  { %1863 = vpow2.f32 %v1726_v55  ;;  %v398_v55 = vld [vmem:[#allocation3] sm:$0xff] }
 0x119   :  { %1865 = vpow2.f32 %v1727_v63  ;;  %v1035_v63 = vsel %vm1034_vm7, 1, %v2861_v53 }
 0x123   :  { %v1862_v3 = vpop.eup %1861 }
 0x124   :  { %v649_v57 = vadd.f32 1.0, %v1862_v3  ;;  %v1277_v3 = vsel %vm1276_vm8, 1, %v2861_v53 }
 0x125   :  { %v1864_v5 = vpop.eup %1863 }
 0x126   :  { %1867 = vrcp.f32 %v649_v57  ;;  %v655_v58 = vadd.f32 1.0, %v1864_v5  ;;  %v1866_v51 = vpop.eup %1865 }
 0x127   :  { %1869 = vtanh.f32 %v644_v7  ;;  %v662_v4 = vadd.f32 1.0, %v1866_v51  ;;  %v1519_v7 = vsel %vm1518_vm9, 1, %v2861_v53 }
 0x128   :  { %1871 = vrcp.f32 %v655_v58 }
 0x129   :  { %1873 = vrcp.f32 %v662_v4 }
 0x133   :  { %v1868_v54 = vpop.eup %1867 }
 0x134   :  { %v1870_v52 = vpop.eup %1869 }
 0x135   :  { %v1872_v1 = vpop.eup %1871  ;;  %v666_v6 = vmul.f32 %v1870_v52, %v1868_v54 }
 0x136   :  { %v665_v62 = vmul.f32 %v1872_v1, %v398_v55  ;;  %v1874_v10 = vpop.eup %1873 }
 0x138   :  { %v667_v60 = vadd.f32 %v666_v6, %v665_v62 }
 0x13a   :  { %1875 = vtanh.f32 %v667_v60  ;;  %v2431_v61 = vsel %vm676_vm5, %v667_v60, %v398_v55 }
 0x147   :  { %v1876_v20 = vpop.eup %1875 }
 0x148   :  { %v669_v59 = vmul.f32 %v1876_v20, %v1874_v10 }
 0x14a   :  { %v2434_v2 = vsel %vm676_vm5, %v669_v59, %v2289_v48  ;;  %v914_v48 = vsel %vm913_vm6, 1, %v2861_v53 }
 0x14b   :  { %v679_v49 = vpack.c.bf16 %v2434_v2, %v2434_v2  ;;  %916 = vperm.xlu1 %1796, %v914_v48  }
 0x14d   :  { %713 = vmatmul.mubr.bf16.vlgmr.msra.gmra.mxu0 %v679_v49  ;;  %754 = vmatmul.mubr.bf16.vlgmr.msra.gmra.mxu1 %v679_v49 }
 0x14e   :  { %802 = vmatpush1.bf16.msra.mxu0 %v2176_v13  ;;  %843 = vmatpush1.bf16.msra.mxu1 %v2178_v14 }
 0x14f   :  { %803 = vmatprep.subr.bf16.mxu0 %v2181_v15  ;;  %844 = vmatprep.subr.bf16.mxu1 %v2184_v16 }
 0x150   :  { %833 = vmatprep.mubr.bf16.mxu0 %v2861_v53  ;;  %874 = vmatprep.mubr.bf16.mxu1 %v2861_v53 }
 0x151   :  { %1037 = vperm.xlu1 %1796, %v1035_v63  }
 0x152   :  { %804 = vmatpush1.bf16.msra.mxu0 %v2188_v17  ;;  %845 = vmatpush1.bf16.msra.mxu1 %v2192_v18 }
 0x153   :  { %805 = vmatprep.subr.bf16.mxu0 %v2196_v19  ;;  %846 = vmatprep.subr.bf16.mxu1 %v2201_v21 }
 0x155   :  { %1279 = vperm.xlu1 %1796, %v1277_v3  }
 0x156   :  { %806 = vmatpush1.bf16.msra.mxu0 %v2203_v22  ;;  %847 = vmatpush1.bf16.msra.mxu1 %v2207_v23 }
 0x157   :  { %807 = vmatprep.subr.bf16.mxu0 %v2211_v24  ;;  %848 = vmatprep.subr.bf16.mxu1 %v2213_v25 }
 0x159   :  { %1521 = vperm.xlu1 %1796, %v1519_v7  }
 0x15a   :  { %808 = vmatpush1.bf16.msra.mxu0 %v2217_v26  ;;  %849 = vmatpush1.bf16.msra.mxu1 %v2221_v27 }
 0x15b   :  { %809 = vmatprep.subr.bf16.mxu0 %v2225_v28  ;;  %850 = vmatprep.subr.bf16.mxu1 %v2227_v29 }
 0x15e   :  { %810 = vmatpush1.bf16.msra.mxu0 %v2232_v31  ;;  %851 = vmatpush1.bf16.msra.mxu1 %v2234_v32 }
 0x15f   :  { %811 = vmatprep.subr.bf16.mxu0 %v2238_v33  ;;  %852 = vmatprep.subr.bf16.mxu1 %v2242_v34 }
 0x162   :  { %812 = vmatpush1.bf16.msra.mxu0 %v2246_v35  ;;  %853 = vmatpush1.bf16.msra.mxu1 %v2248_v36 }
 0x163   :  { %813 = vmatprep.subr.bf16.mxu0 %v2252_v37  ;;  %854 = vmatprep.subr.bf16.mxu1 %v2256_v38 }
 0x166   :  { %814 = vmatpush1.bf16.msra.mxu0 %v2268_v41  ;;  %855 = vmatpush1.bf16.msra.mxu1 %v2270_v42 }
 0x167   :  { %815 = vmatprep.subr.bf16.mxu0 %v2275_v43  ;;  %856 = vmatprep.subr.bf16.mxu1 %v2277_v44 }
 0x16a   :  { %816 = vmatpush1.bf16.msra.mxu0 %v2285_v46  ;;  %857 = vmatpush1.bf16.msra.mxu1 %v2287_v47 }
 0x16b   :  { %922 = vmatprep.subr.bf16.mxu0 %v2172_v11  ;;  %963 = vmatprep.subr.bf16.mxu1 %v2174_v12 }
 0x20d   :  { %v714_v57 = vpop.f32.mrf.mxu0  ;;  %v755_v5 = vpop.f32.mrf.mxu1 }
 0x20e   :  { %v762_v58 = vadd.f32 %v714_v57, %v2355_v8  ;;  %v764_v60 = vadd.f32 %v755_v5, %v2358_v9 }
 0x20f   :  { %v716_v51 = vpop.f32.mrf.mxu0  ;;  %v757_v54 = vpop.f32.mrf.mxu1 }
 0x210   :  { %v1728_v55 = vmul.f32 -1.442695, %v762_v58  ;;  %v763_v52 = vadd.f32 %v716_v51, %v2360_v30  ;;  %v765_v40 = vadd.f32 %v757_v54, %v2363_v39  ;;  %v796_v39 = vpop.permute.xlu0 %795 }
 0x211   :  { %v718_v45 = vpop.f32.mrf.mxu0  ;;  %v759_v1 = vpop.f32.mrf.mxu1  ;;  %vm797_vm10 = vcmp.eq.s32.totalorder %v796_v39, 1 }
 0x212   :  { %1877 = vpow2.f32 %v1728_v55  ;;  %v1729_v4 = vmul.f32 -1.442695, %v763_v52  ;;  %v1730_v10 = vmul.f32 -1.442695, %v765_v40  ;;  %v2862_v40 = vld [vmem:[#allocation16_spill] sm:$0xff] }
 0x213   :  { %v719_v62 = vpop.f32.mrf.mxu0  ;;  %v760_v6 = vpop.f32.mrf.mxu1 }
 0x214   :  { %1879 = vpow2.f32 %v1729_v4 }
 0x215   :  { %1881 = vtanh.f32 %v764_v60 }
 0x216   :  { %1883 = vpow2.f32 %v1730_v10 }
 0x21f   :  { %v1878_v20 = vpop.eup %1877 }
 0x220   :  { %v769_v59 = vadd.f32 1.0, %v1878_v20 }
 0x221   :  { %v1880_v8 = vpop.eup %1879 }
 0x222   :  { %1885 = vrcp.f32 %v769_v59  ;;  %v775_v49 = vadd.f32 1.0, %v1880_v8  ;;  %v1882_v30 = vpop.eup %1881 }
 0x223   :  { %v1884_v48 = vpop.eup %1883 }
 0x224   :  { %1887 = vrcp.f32 %v775_v49  ;;  %v782_v57 = vadd.f32 1.0, %v1884_v48 }
 0x226   :  { %1889 = vrcp.f32 %v782_v57 }
 0x22f   :  { %v1886_v63 = vpop.eup %1885 }
 0x230   :  { %v786_v3 = vmul.f32 %v1886_v63, %v1882_v30  ;;  %v2863_v30 = vld [vmem:[#allocation17_spill] sm:$0xff]  ;;  %v2864_v63 = vld [vmem:[#allocation15_spill] sm:$0xff] }
 0x231   :  { %v1888_v7 = vpop.eup %1887 }
 0x232   :  { %v785_v58 = vmul.f32 %v1888_v7, %v2431_v61 }
 0x233   :  { %v1890_v5 = vpop.eup %1889 }
 0x234   :  { %v787_v51 = vadd.f32 %v786_v3, %v785_v58 }
 0x236   :  { %1891 = vtanh.f32 %v787_v51  ;;  %v2486_v9 = vsel %vm797_vm10, %v787_v51, %v2431_v61 }
 0x243   :  { %v1892_v54 = vpop.eup %1891 }
 0x244   :  { %v789_v55 = vmul.f32 %v1892_v54, %v1890_v5 }
 0x246   :  { %v2489_v52 = vsel %vm797_vm10, %v789_v55, %v2434_v2  ;;  %v917_v55 = vpop.permute.xlu1 %916 }
 0x247   :  { %v800_v45 = vpack.c.bf16 %v2489_v52, %v2489_v52  ;;  %vm918_vm11 = vcmp.eq.s32.totalorder %v917_v55, 1 }
 0x249   :  { %834 = vmatmul.mubr.bf16.vlgmr.msra.gmra.mxu0 %v800_v45  ;;  %875 = vmatmul.mubr.bf16.vlgmr.msra.gmra.mxu1 %v800_v45 }
 0x24a   :  { %923 = vmatpush1.bf16.msra.mxu0 %v2176_v13  ;;  %964 = vmatpush1.bf16.msra.mxu1 %v2178_v14 }
 0x24b   :  { %924 = vmatprep.subr.bf16.mxu0 %v2181_v15  ;;  %965 = vmatprep.subr.bf16.mxu1 %v2184_v16 }
 0x24c   :  { %954 = vmatprep.mubr.bf16.mxu0 %v2861_v53  ;;  %995 = vmatprep.mubr.bf16.mxu1 %v2861_v53 }
 0x24e   :  { %925 = vmatpush1.bf16.msra.mxu0 %v2188_v17  ;;  %966 = vmatpush1.bf16.msra.mxu1 %v2192_v18 }
 0x24f   :  { %926 = vmatprep.subr.bf16.mxu0 %v2196_v19  ;;  %967 = vmatprep.subr.bf16.mxu1 %v2201_v21 }
 0x252   :  { %927 = vmatpush1.bf16.msra.mxu0 %v2203_v22  ;;  %968 = vmatpush1.bf16.msra.mxu1 %v2207_v23 }
 0x253   :  { %928 = vmatprep.subr.bf16.mxu0 %v2211_v24  ;;  %969 = vmatprep.subr.bf16.mxu1 %v2213_v25 }
 0x256   :  { %929 = vmatpush1.bf16.msra.mxu0 %v2217_v26  ;;  %970 = vmatpush1.bf16.msra.mxu1 %v2221_v27 }
 0x257   :  { %930 = vmatprep.subr.bf16.mxu0 %v2225_v28  ;;  %971 = vmatprep.subr.bf16.mxu1 %v2227_v29 }
 0x25a   :  { %931 = vmatpush1.bf16.msra.mxu0 %v2232_v31  ;;  %972 = vmatpush1.bf16.msra.mxu1 %v2234_v32 }
 0x25b   :  { %932 = vmatprep.subr.bf16.mxu0 %v2238_v33  ;;  %973 = vmatprep.subr.bf16.mxu1 %v2242_v34 }
 0x25e   :  { %933 = vmatpush1.bf16.msra.mxu0 %v2246_v35  ;;  %974 = vmatpush1.bf16.msra.mxu1 %v2248_v36 }
 0x25f   :  { %934 = vmatprep.subr.bf16.mxu0 %v2252_v37  ;;  %975 = vmatprep.subr.bf16.mxu1 %v2256_v38 }
 0x262   :  { %935 = vmatpush1.bf16.msra.mxu0 %v2268_v41  ;;  %976 = vmatpush1.bf16.msra.mxu1 %v2270_v42 }
 0x263   :  { %936 = vmatprep.subr.bf16.mxu0 %v2275_v43  ;;  %977 = vmatprep.subr.bf16.mxu1 %v2277_v44 }
 0x266   :  { %937 = vmatpush1.bf16.msra.mxu0 %v2285_v46  ;;  %978 = vmatpush1.bf16.msra.mxu1 %v2287_v47 }
 0x267   :  { %1043 = vmatprep.subr.bf16.mxu0 %v2172_v11  ;;  %1084 = vmatprep.subr.bf16.mxu1 %v2174_v12 }
 0x309   :  { %v835_v61 = vpop.f32.mrf.mxu0  ;;  %v876_v2 = vpop.f32.mrf.mxu1 }
 0x30a   :  { %v883_v1 = vadd.f32 %v835_v61, %v2365_v50  ;;  %v885_v3 = vadd.f32 %v876_v2, %v2864_v63 }
 0x30b   :  { %v837_v4 = vpop.f32.mrf.mxu0  ;;  %v878_v62 = vpop.f32.mrf.mxu1 }
 0x30c   :  { %v1731_v6 = vmul.f32 -1.442695, %v883_v1  ;;  %v884_v60 = vadd.f32 %v837_v4, %v2862_v40  ;;  %v886_v48 = vadd.f32 %v878_v62, %v2863_v30  ;;  %v2868_v30 = vld [vmem:[#allocation19_spill] sm:$0xff] }
 0x30d   :  { %v839_v10 = vpop.f32.mrf.mxu0  ;;  %v880_v20 = vpop.f32.mrf.mxu1 }
 0x30e   :  { %1893 = vpow2.f32 %v1731_v6  ;;  %v1732_v59 = vmul.f32 -1.442695, %v884_v60  ;;  %v1733_v7 = vmul.f32 -1.442695, %v886_v48 }
 0x30f   :  { %v840_v8 = vpop.f32.mrf.mxu0  ;;  %v881_v49 = vpop.f32.mrf.mxu1 }
 0x310   :  { %1895 = vpow2.f32 %v1732_v59  ;;  %v2867_v49 = vld [vmem:[#allocation21_spill] sm:$0xff] }
 0x311   :  { %1897 = vtanh.f32 %v885_v3 }
 0x312   :  { %1899 = vpow2.f32 %v1733_v7 }
 0x31b   :  { %v1894_v57 = vpop.eup %1893 }
 0x31c   :  { %v890_v58 = vadd.f32 1.0, %v1894_v57 }
 0x31d   :  { %v1896_v50 = vpop.eup %1895 }
 0x31e   :  { %1901 = vrcp.f32 %v890_v58  ;;  %v896_v39 = vadd.f32 1.0, %v1896_v50  ;;  %v1898_v51 = vpop.eup %1897 }
 0x31f   :  { %v1900_v5 = vpop.eup %1899 }
 0x320   :  { %1903 = vrcp.f32 %v896_v39  ;;  %v903_v1 = vadd.f32 1.0, %v1900_v5 }
 0x322   :  { %1905 = vrcp.f32 %v903_v1 }
 0x32b   :  { %v1902_v54 = vpop.eup %1901 }
 0x32c   :  { %v907_v45 = vmul.f32 %v1902_v54, %v1898_v51 }
 0x32d   :  { %v1904_v61 = vpop.eup %1903 }
 0x32e   :  { %v906_v4 = vmul.f32 %v1904_v61, %v2486_v9 }
 0x32f   :  { %v1906_v6 = vpop.eup %1905 }
 0x330   :  { %v908_v2 = vadd.f32 %v907_v45, %v906_v4  ;;  %v1038_v45 = vpop.permute.xlu1 %1037 }
 0x331   :  { %vm1039_vm12 = vcmp.eq.s32.totalorder %v1038_v45, 1  ;;  %v2679_v45 = vld [vmem:[#allocation9 + $0x88] ss:$16 sps:$4 sm:$0xff]  }
 0x332   :  { %1907 = vtanh.f32 %v908_v2  ;;  %v2533_v62 = vsel %vm918_vm11, %v908_v2, %v2486_v9 }
 0x33f   :  { %v1908_v40 = vpop.eup %1907 }
 0x340   :  { %v910_v60 = vmul.f32 %v1908_v40, %v1906_v6 }
 0x342   :  { %v2536_v10 = vsel %vm918_vm11, %v910_v60, %v2489_v52 }
 0x343   :  { %v921_v20 = vpack.c.bf16 %v2536_v10, %v2536_v10 }
 0x345   :  { %955 = vmatmul.mubr.bf16.vlgmr.msra.gmra.mxu0 %v921_v20  ;;  %996 = vmatmul.mubr.bf16.vlgmr.msra.gmra.mxu1 %v921_v20  ;;  %v2587_v20 = vld [vmem:[#allocation9 + $0xe0] ss:$16 sps:$4 sm:$0xff]  }
 0x346   :  { %1044 = vmatpush1.bf16.msra.mxu0 %v2176_v13  ;;  %1085 = vmatpush1.bf16.msra.mxu1 %v2178_v14 }
 0x347   :  { %1045 = vmatprep.subr.bf16.mxu0 %v2181_v15  ;;  %1086 = vmatprep.subr.bf16.mxu1 %v2184_v16  ;;  %v2865_v15 = vld [vmem:[#allocation18_spill] sm:$0xff] }
 0x348   :  { %1075 = vmatprep.mubr.bf16.mxu0 %v2861_v53  ;;  %1116 = vmatprep.mubr.bf16.mxu1 %v2861_v53 }
 0x34a   :  { %1046 = vmatpush1.bf16.msra.mxu0 %v2188_v17  ;;  %1087 = vmatpush1.bf16.msra.mxu1 %v2192_v18 }
 0x34b   :  { %1047 = vmatprep.subr.bf16.mxu0 %v2196_v19  ;;  %1088 = vmatprep.subr.bf16.mxu1 %v2201_v21  ;;  %v2866_v21 = vld [vmem:[#allocation20_spill] sm:$0xff] }
 0x34e   :  { %1048 = vmatpush1.bf16.msra.mxu0 %v2203_v22  ;;  %1089 = vmatpush1.bf16.msra.mxu1 %v2207_v23 }
 0x34f   :  { %1049 = vmatprep.subr.bf16.mxu0 %v2211_v24  ;;  %1090 = vmatprep.subr.bf16.mxu1 %v2213_v25 }
 0x352   :  { %1050 = vmatpush1.bf16.msra.mxu0 %v2217_v26  ;;  %1091 = vmatpush1.bf16.msra.mxu1 %v2221_v27 }
 0x353   :  { %1051 = vmatprep.subr.bf16.mxu0 %v2225_v28  ;;  %1092 = vmatprep.subr.bf16.mxu1 %v2227_v29 }
 0x356   :  { %1052 = vmatpush1.bf16.msra.mxu0 %v2232_v31  ;;  %1093 = vmatpush1.bf16.msra.mxu1 %v2234_v32 }
 0x357   :  { %1053 = vmatprep.subr.bf16.mxu0 %v2238_v33  ;;  %1094 = vmatprep.subr.bf16.mxu1 %v2242_v34 }
 0x35a   :  { %1054 = vmatpush1.bf16.msra.mxu0 %v2246_v35  ;;  %1095 = vmatpush1.bf16.msra.mxu1 %v2248_v36 }
 0x35b   :  { %1055 = vmatprep.subr.bf16.mxu0 %v2252_v37  ;;  %1096 = vmatprep.subr.bf16.mxu1 %v2256_v38 }
 0x35e   :  { %1056 = vmatpush1.bf16.msra.mxu0 %v2268_v41  ;;  %1097 = vmatpush1.bf16.msra.mxu1 %v2270_v42 }
 0x35f   :  { %1057 = vmatprep.subr.bf16.mxu0 %v2275_v43  ;;  %1098 = vmatprep.subr.bf16.mxu1 %v2277_v44 }
 0x362   :  { %1058 = vmatpush1.bf16.msra.mxu0 %v2285_v46  ;;  %1099 = vmatpush1.bf16.msra.mxu1 %v2287_v47 }
 0x363   :  { %1164 = vmatprep.subr.bf16.mxu0 %v2172_v11  ;;  %1205 = vmatprep.subr.bf16.mxu1 %v2174_v12 }
 0x405   :  { %v956_v13 = vpop.f32.mrf.mxu0  ;;  %v997_v14 = vpop.f32.mrf.mxu1 }
 0x406   :  { %v1004_v16 = vadd.f32 %v956_v13, %v2865_v15  ;;  %v1006_v12 = vadd.f32 %v997_v14, %v2868_v30  ;;  %v2590_v13 = vld [vmem:[#allocation9 + $0xe8] ss:$16 sps:$4 sm:$0xff]   ;;  %v2596_v14 = vld [vmem:[#allocation9 + $0xcc] ss:$16 sps:$4 sm:$0xff]  }
 0x407   :  { %v958_v17 = vpop.f32.mrf.mxu0  ;;  %v999_v18 = vpop.f32.mrf.mxu1  ;;  %v2604_v15 = vld [vmem:[#allocation9 + $0xc8] ss:$16 sps:$4 sm:$0xff]  }
 0x408   :  { %v1734_v19 = vmul.f32 -1.442695, %v1004_v16  ;;  %v1005_v22 = vadd.f32 %v958_v17, %v2866_v21  ;;  %v1007_v11 = vadd.f32 %v999_v18, %v2867_v49  ;;  %v2607_v16 = vld [vmem:[#allocation9 + $0xa4] ss:$16 sps:$4 sm:$0xff]   ;;  %v2610_v17 = vld [vmem:[#allocation9 + $0xac] ss:$16 sps:$4 sm:$0xff]  }
 0x409   :  { %v960_v23 = vpop.f32.mrf.mxu0  ;;  %v1001_v9 = vpop.f32.mrf.mxu1  ;;  %v2613_v18 = vld [vmem:[#allocation9 + $0xa0] ss:$16 sps:$4 sm:$0xff]  }
 0x40a   :  { %1909 = vpow2.f32 %v1734_v19  ;;  %v1735_v52 = vmul.f32 -1.442695, %v1005_v22  ;;  %v1736_v48 = vmul.f32 -1.442695, %v1007_v11  ;;  %v2616_v19 = vld [vmem:[#allocation9 + $0xa8] ss:$16 sps:$4 sm:$0xff]  }
 0x40b   :  { %v961_v59 = vpop.f32.mrf.mxu0  ;;  %v1002_v8 = vpop.f32.mrf.mxu1 }
 0x40c   :  { %1911 = vpow2.f32 %v1735_v52 }
 0x40d   :  { %1913 = vtanh.f32 %v1006_v12 }
 0x40e   :  { %1915 = vpow2.f32 %v1736_v48 }
 0x417   :  { %v1910_v63 = vpop.eup %1909 }
 0x418   :  { %v1011_v3 = vadd.f32 1.0, %v1910_v63  ;;  %v1159_v63 = vpop.permute.xlu0 %1158 }
 0x419   :  { %v1912_v7 = vpop.eup %1911  ;;  %vm1160_vm13 = vcmp.eq.s32.totalorder %v1159_v63, 1 }
 0x41a   :  { %1917 = vrcp.f32 %v1011_v3  ;;  %v1017_v57 = vadd.f32 1.0, %v1912_v7  ;;  %v1914_v58 = vpop.eup %1913 }
 0x41b   :  { %v1916_v50 = vpop.eup %1915 }
 0x41c   :  { %1919 = vrcp.f32 %v1017_v57  ;;  %v1024_v54 = vadd.f32 1.0, %v1916_v50 }
 0x41e   :  { %1921 = vrcp.f32 %v1024_v54  ;;  %v2673_v54 = vld [vmem:[#allocation9 + $0x8c] ss:$16 sps:$4 sm:$0xff]  }
 0x427   :  { %v1918_v39 = vpop.eup %1917 }
 0x428   :  { %v1028_v51 = vmul.f32 %v1918_v39, %v1914_v58 }
 0x429   :  { %v1920_v5 = vpop.eup %1919 }
 0x42a   :  { %v1027_v55 = vmul.f32 %v1920_v5, %v2533_v62  ;;  %v2670_v5 = vld [vmem:[#allocation9 + $0x84] ss:$16 sps:$4 sm:$0xff]  }
 0x42b   :  { %v1922_v4 = vpop.eup %1921 }
 0x42c   :  { %v1029_v61 = vadd.f32 %v1028_v51, %v1027_v55  ;;  %v2676_v55 = vld [vmem:[#allocation9 + $0x80] ss:$16 sps:$4 sm:$0xff]  }
 0x42e   :  { %1923 = vtanh.f32 %v1029_v61  ;;  %v2580_v1 = vsel %vm1039_vm12, %v1029_v61, %v2533_v62  ;;  %v2593_v62 = vld [vmem:[#allocation9 + $0xc4] ss:$16 sps:$4 sm:$0xff]  }
 0x42f   :  { %v2682_v61 = vld [vmem:[#allocation9 + $0x64] ss:$16 sps:$4 sm:$0xff]  }
 0x43b   :  { %v1924_v2 = vpop.eup %1923 }
 0x43c   :  { %v1031_v6 = vmul.f32 %v1924_v2, %v1922_v4  ;;  %v2688_v4 = vld [vmem:[#allocation9 + $0x60] ss:$16 sps:$4 sm:$0xff]   ;;  %v2691_v2 = vld [vmem:[#allocation9 + $0x68] ss:$16 sps:$4 sm:$0xff]  }
 0x43e   :  { %v2583_v40 = vsel %vm1039_vm12, %v1031_v6, %v2536_v10  ;;  %v2601_v10 = vld [vmem:[#allocation9 + $0xc0] ss:$16 sps:$4 sm:$0xff]   ;;  %v2694_v6 = vld [vmem:[#allocation9 + $0x44] ss:$16 sps:$4 sm:$0xff]  }
 0x43f   :  { %v1042_v60 = vpack.c.bf16 %v2583_v40, %v2583_v40 }
 0x441   :  { %1076 = vmatmul.mubr.bf16.vlgmr.msra.gmra.mxu0 %v1042_v60  ;;  %1117 = vmatmul.mubr.bf16.vlgmr.msra.gmra.mxu1 %v1042_v60  ;;  %v2700_v60 = vld [vmem:[#allocation9 + $0x40] ss:$16 sps:$4 sm:$0xff]  }
 0x442   :  { %1165 = vmatpush1.bf16.msra.mxu0 %v2587_v20  ;;  %1206 = vmatpush1.bf16.msra.mxu1 %v2590_v13 }
 0x443   :  { %1166 = vmatprep.subr.bf16.mxu0 %v2593_v62  ;;  %1207 = vmatprep.subr.bf16.mxu1 %v2596_v14 }
 0x444   :  { %1196 = vmatprep.mubr.bf16.mxu0 %v2861_v53  ;;  %1237 = vmatprep.mubr.bf16.mxu1 %v2861_v53 }
 0x446   :  { %1167 = vmatpush1.bf16.msra.mxu0 %v2601_v10  ;;  %1208 = vmatpush1.bf16.msra.mxu1 %v2604_v15 }
 0x447   :  { %1168 = vmatprep.subr.bf16.mxu0 %v2607_v16  ;;  %1209 = vmatprep.subr.bf16.mxu1 %v2610_v17 }
 0x44a   :  { %1169 = vmatpush1.bf16.msra.mxu0 %v2613_v18  ;;  %1210 = vmatpush1.bf16.msra.mxu1 %v2616_v19 }
 0x44b   :  { %1170 = vmatprep.subr.bf16.mxu0 %v2211_v24  ;;  %1211 = vmatprep.subr.bf16.mxu1 %v2213_v25  ;;  %v2639_v24 = vld [vmem:[#allocation9 + $0xe4] ss:$16 sps:$4 sm:$0xff]   ;;  %v2642_v25 = vld [vmem:[#allocation9 + $0xec] ss:$16 sps:$4 sm:$0xff]  }
 0x44e   :  { %1171 = vmatpush1.bf16.msra.mxu0 %v2217_v26  ;;  %1212 = vmatpush1.bf16.msra.mxu1 %v2221_v27 }
 0x44f   :  { %1172 = vmatprep.subr.bf16.mxu0 %v2225_v28  ;;  %1213 = vmatprep.subr.bf16.mxu1 %v2227_v29  ;;  %v2869_v28 = vld [vmem:[#allocation22_spill] sm:$0xff] }
 0x452   :  { %1173 = vmatpush1.bf16.msra.mxu0 %v2232_v31  ;;  %1214 = vmatpush1.bf16.msra.mxu1 %v2234_v32 }
 0x453   :  { %1174 = vmatprep.subr.bf16.mxu0 %v2238_v33  ;;  %1215 = vmatprep.subr.bf16.mxu1 %v2242_v34  ;;  %v2870_v34 = vld [vmem:[#allocation24_spill] sm:$0xff] }
 0x456   :  { %1175 = vmatpush1.bf16.msra.mxu0 %v2246_v35  ;;  %1216 = vmatpush1.bf16.msra.mxu1 %v2248_v36 }
 0x457   :  { %1176 = vmatprep.subr.bf16.mxu0 %v2252_v37  ;;  %1217 = vmatprep.subr.bf16.mxu1 %v2256_v38 }
 0x45a   :  { %1177 = vmatpush1.bf16.msra.mxu0 %v2268_v41  ;;  %1218 = vmatpush1.bf16.msra.mxu1 %v2270_v42 }
 0x45b   :  { %1178 = vmatprep.subr.bf16.mxu0 %v2275_v43  ;;  %1219 = vmatprep.subr.bf16.mxu1 %v2277_v44  ;;  %v2871_v43 = vld [vmem:[#allocation25_spill] sm:$0xff] }
 0x45e   :  { %1179 = vmatpush1.bf16.msra.mxu0 %v2285_v46  ;;  %1220 = vmatpush1.bf16.msra.mxu1 %v2287_v47  ;;  %v2872_v46 = vld [vmem:[#allocation23_spill] sm:$0xff] }
 0x45f   :  { %1285 = vmatprep.subr.bf16.mxu0 %v2639_v24  ;;  %1326 = vmatprep.subr.bf16.mxu1 %v2642_v25 }
 0x501   :  { %v1077_v26 = vpop.f32.mrf.mxu0  ;;  %v1118_v27 = vpop.f32.mrf.mxu1 }
 0x502   :  { %v1125_v29 = vadd.f32 %v1077_v26, %v2869_v28  ;;  %v1127_v47 = vadd.f32 %v1118_v27, %v2872_v46  ;;  %v2703_v26 = vld [vmem:[#allocation9 + $0x48] ss:$16 sps:$4 sm:$0xff]   ;;  %v2706_v27 = vld [vmem:[#allocation9 + $0x24] ss:$16 sps:$4 sm:$0xff]   ;;  %v2709_v28 = vld [vmem:[#allocation9 + $0x2c] ss:$16 sps:$4 sm:$0xff]  }
 0x503   :  { %v1079_v31 = vpop.f32.mrf.mxu0  ;;  %v1120_v32 = vpop.f32.mrf.mxu1  ;;  %v2874_v46 = vld [vmem:[#allocation28_spill] sm:$0xff] }
 0x504   :  { %v1737_v33 = vmul.f32 -1.442695, %v1125_v29  ;;  %v1126_v35 = vadd.f32 %v1079_v31, %v2870_v34  ;;  %v1128_v44 = vadd.f32 %v1120_v32, %v2871_v43  ;;  %v2712_v29 = vld [vmem:[#allocation9 + $0x20] ss:$16 sps:$4 sm:$0xff]   ;;  %v2715_v31 = vld [vmem:[#allocation9 + $0x28] ss:$16 sps:$4 sm:$0xff]  }
 0x505   :  { %v1081_v36 = vpop.f32.mrf.mxu0  ;;  %v1122_v37 = vpop.f32.mrf.mxu1  ;;  %v2718_v32 = vld [vmem:[#allocation9 + $0x4] ss:$16 sps:$4 sm:$0xff]   ;;  %v2724_v34 = vld [vmem:[#allocation9] ss:$16 sps:$4 sm:$0xff]  }
 0x506   :  { %1925 = vpow2.f32 %v1737_v33  ;;  %v1738_v38 = vmul.f32 -1.442695, %v1126_v35  ;;  %v1739_v21 = vmul.f32 -1.442695, %v1128_v44  ;;  %v2721_v33 = vld [vmem:[#allocation9 + $0xc] ss:$16 sps:$4 sm:$0xff]  }
 0x507   :  { %v1082_v41 = vpop.f32.mrf.mxu0  ;;  %v1123_v42 = vpop.f32.mrf.mxu1  ;;  %v2727_v35 = vld [vmem:[#allocation9 + $0x8] ss:$16 sps:$4 sm:$0xff]  }
 0x508   :  { %1927 = vpow2.f32 %v1738_v38  ;;  %v2873_v38 = vld [vmem:[#allocation26_spill] sm:$0xff] }
 0x509   :  { %1929 = vtanh.f32 %v1127_v47 }
 0x50a   :  { %1931 = vpow2.f32 %v1739_v21 }
 0x513   :  { %v1926_v22 = vpop.eup %1925 }
 0x514   :  { %v1132_v23 = vadd.f32 1.0, %v1926_v22 }
 0x515   :  { %v1928_v9 = vpop.eup %1927 }
 0x516   :  { %1933 = vrcp.f32 %v1132_v23  ;;  %v1138_v52 = vadd.f32 1.0, %v1928_v9  ;;  %v1930_v59 = vpop.eup %1929 }
 0x517   :  { %v1932_v8 = vpop.eup %1931 }
 0x518   :  { %1935 = vrcp.f32 %v1138_v52  ;;  %v1145_v12 = vadd.f32 1.0, %v1932_v8  ;;  %v2876_v8 = vld [vmem:[#allocation27_spill] sm:$0xff] }
 0x51a   :  { %1937 = vrcp.f32 %v1145_v12 }
 0x523   :  { %v1934_v49 = vpop.eup %1933 }
 0x524   :  { %v1149_v11 = vmul.f32 %v1934_v49, %v1930_v59  ;;  %v2875_v59 = vld [vmem:[#allocation29_spill] sm:$0xff] }
 0x525   :  { %v1936_v30 = vpop.eup %1935 }
 0x526   :  { %v1148_v48 = vmul.f32 %v1936_v30, %v2580_v1 }
 0x527   :  { %v1938_v57 = vpop.eup %1937 }
 0x528   :  { %v1150_v3 = vadd.f32 %v1149_v11, %v1148_v48 }
 0x52a   :  { %1939 = vtanh.f32 %v1150_v3  ;;  %v2651_v7 = vsel %vm1160_vm13, %v1150_v3, %v2580_v1  ;;  %v2685_v1 = vld [vmem:[#allocation9 + $0x6c] ss:$16 sps:$4 sm:$0xff]  }
 0x537   :  { %v1940_v58 = vpop.eup %1939 }
 0x538   :  { %v1152_v50 = vmul.f32 %v1940_v58, %v1938_v57 }
 0x53a   :  { %v2654_v39 = vsel %vm1160_vm13, %v1152_v50, %v2583_v40  ;;  %v2697_v40 = vld [vmem:[#allocation9 + $0x4c] ss:$16 sps:$4 sm:$0xff]  }
 0x53b   :  { %v1163_v51 = vpack.c.bf16 %v2654_v39, %v2654_v39 }
 0x53d   :  { %1197 = vmatmul.mubr.bf16.vlgmr.msra.gmra.mxu0 %v1163_v51  ;;  %1238 = vmatmul.mubr.bf16.vlgmr.msra.gmra.mxu1 %v1163_v51 }
 0x53e   :  { %1286 = vmatpush1.bf16.msra.mxu0 %v2587_v20  ;;  %1327 = vmatpush1.bf16.msra.mxu1 %v2590_v13 }
 0x53f   :  { %1287 = vmatprep.subr.bf16.mxu0 %v2593_v62  ;;  %1328 = vmatprep.subr.bf16.mxu1 %v2596_v14 }
 0x540   :  { %1317 = vmatprep.mubr.bf16.mxu0 %v2861_v53  ;;  %1358 = vmatprep.mubr.bf16.mxu1 %v2861_v53 }
 0x542   :  { %1288 = vmatpush1.bf16.msra.mxu0 %v2601_v10  ;;  %1329 = vmatpush1.bf16.msra.mxu1 %v2604_v15 }
 0x543   :  { %1289 = vmatprep.subr.bf16.mxu0 %v2607_v16  ;;  %1330 = vmatprep.subr.bf16.mxu1 %v2610_v17 }
 0x546   :  { %1290 = vmatpush1.bf16.msra.mxu0 %v2613_v18  ;;  %1331 = vmatpush1.bf16.msra.mxu1 %v2616_v19 }
 0x547   :  { %1291 = vmatprep.subr.bf16.mxu0 %v2670_v5  ;;  %1332 = vmatprep.subr.bf16.mxu1 %v2673_v54 }
 0x54a   :  { %1292 = vmatpush1.bf16.msra.mxu0 %v2676_v55  ;;  %1333 = vmatpush1.bf16.msra.mxu1 %v2679_v45 }
 0x54b   :  { %1293 = vmatprep.subr.bf16.mxu0 %v2682_v61  ;;  %1334 = vmatprep.subr.bf16.mxu1 %v2685_v1 }
 0x54e   :  { %1294 = vmatpush1.bf16.msra.mxu0 %v2688_v4  ;;  %1335 = vmatpush1.bf16.msra.mxu1 %v2691_v2 }
 0x54f   :  { %1295 = vmatprep.subr.bf16.mxu0 %v2694_v6  ;;  %1336 = vmatprep.subr.bf16.mxu1 %v2697_v40 }
 0x552   :  { %1296 = vmatpush1.bf16.msra.mxu0 %v2700_v60  ;;  %1337 = vmatpush1.bf16.msra.mxu1 %v2703_v26 }
 0x553   :  { %1297 = vmatprep.subr.bf16.mxu0 %v2706_v27  ;;  %1338 = vmatprep.subr.bf16.mxu1 %v2709_v28 }
 0x556   :  { %1298 = vmatpush1.bf16.msra.mxu0 %v2712_v29  ;;  %1339 = vmatpush1.bf16.msra.mxu1 %v2715_v31 }
 0x557   :  { %1299 = vmatprep.subr.bf16.mxu0 %v2718_v32  ;;  %1340 = vmatprep.subr.bf16.mxu1 %v2721_v33 }
 0x55a   :  { %1300 = vmatpush1.bf16.msra.mxu0 %v2724_v34  ;;  %1341 = vmatpush1.bf16.msra.mxu1 %v2727_v35 }
 0x55b   :  { %1406 = vmatprep.subr.bf16.mxu0 %v2639_v24  ;;  %1447 = vmatprep.subr.bf16.mxu1 %v2642_v25 }
 0x5fd   :  { %v1198_v36 = vpop.f32.mrf.mxu0  ;;  %v1239_v37 = vpop.f32.mrf.mxu1 }
 0x5fe   :  { %v1246_v41 = vadd.f32 %v1198_v36, %v2873_v38  ;;  %v1248_v25 = vadd.f32 %v1239_v37, %v2876_v8  ;;  %v1280_v38 = vpop.permute.xlu1 %1279  ;;  %v2881_v8 = vld [vmem:[#allocation34_spill] sm:$0xff] }
 0x5ff   :  { %v1200_v42 = vpop.f32.mrf.mxu0  ;;  %v1241_v43 = vpop.f32.mrf.mxu1  ;;  %vm1281_vm14 = vcmp.eq.s32.totalorder %v1280_v38, 1 }
 0x600   :  { %v1740_v44 = vmul.f32 -1.442695, %v1246_v41  ;;  %v1247_v47 = vadd.f32 %v1200_v42, %v2874_v46  ;;  %v1249_v24 = vadd.f32 %v1241_v43, %v2875_v59 }
 0x601   :  { %v1202_v21 = vpop.f32.mrf.mxu0  ;;  %v1243_v22 = vpop.f32.mrf.mxu1 }
 0x602   :  { %1941 = vpow2.f32 %v1740_v44  ;;  %v1741_v23 = vmul.f32 -1.442695, %v1247_v47  ;;  %v1742_v49 = vmul.f32 -1.442695, %v1249_v24 }
 0x603   :  { %v1203_v9 = vpop.f32.mrf.mxu0  ;;  %v1244_v52 = vpop.f32.mrf.mxu1 }
 0x604   :  { %1943 = vpow2.f32 %v1741_v23 }
 0x605   :  { %1945 = vtanh.f32 %v1248_v25 }
 0x606   :  { %1947 = vpow2.f32 %v1742_v49 }
 0x60f   :  { %v1942_v11 = vpop.eup %1941 }
 0x610   :  { %v1253_v30 = vadd.f32 1.0, %v1942_v11 }
 0x611   :  { %v1944_v12 = vpop.eup %1943 }
 0x612   :  { %1949 = vrcp.f32 %v1253_v30  ;;  %v1259_v48 = vadd.f32 1.0, %v1944_v12  ;;  %v1946_v63 = vpop.eup %1945 }
 0x613   :  { %v1948_v3 = vpop.eup %1947 }
 0x614   :  { %1951 = vrcp.f32 %v1259_v48  ;;  %v1266_v51 = vadd.f32 1.0, %v1948_v3 }
 0x616   :  { %1953 = vrcp.f32 %v1266_v51  ;;  %v2882_v51 = vld [vmem:[#allocation35_spill] sm:$0xff] }
 0x61f   :  { %v1950_v57 = vpop.eup %1949 }
 0x620   :  { %v1270_v58 = vmul.f32 %v1950_v57, %v1946_v63 }
 0x621   :  { %v1952_v50 = vpop.eup %1951 }
 0x622   :  { %v1269_v36 = vmul.f32 %v1952_v50, %v2651_v7 }
 0x623   :  { %v1954_v42 = vpop.eup %1953 }
 0x624   :  { %v1271_v41 = vadd.f32 %v1270_v58, %v1269_v36 }
 0x626   :  { %1955 = vtanh.f32 %v1271_v41  ;;  %v2738_v37 = vsel %vm1281_vm14, %v1271_v41, %v2651_v7 }
 0x633   :  { %v1956_v43 = vpop.eup %1955 }
 0x634   :  { %v1273_v44 = vmul.f32 %v1956_v43, %v1954_v42 }
 0x636   :  { %v2741_v46 = vsel %vm1281_vm14, %v1273_v44, %v2654_v39 }
 0x637   :  { %v1284_v47 = vpack.c.bf16 %v2741_v46, %v2741_v46 }
 0x639   :  { %1318 = vmatmul.mubr.bf16.vlgmr.msra.gmra.mxu0 %v1284_v47  ;;  %1359 = vmatmul.mubr.bf16.vlgmr.msra.gmra.mxu1 %v1284_v47 }
 0x63a   :  { %1407 = vmatpush1.bf16.msra.mxu0 %v2587_v20  ;;  %1448 = vmatpush1.bf16.msra.mxu1 %v2590_v13  ;;  %v2877_v13 = vld [vmem:[#allocation30_spill] sm:$0xff] }
 0x63b   :  { %1408 = vmatprep.subr.bf16.mxu0 %v2593_v62  ;;  %1449 = vmatprep.subr.bf16.mxu1 %v2596_v14 }
 0x63c   :  { %1438 = vmatprep.mubr.bf16.mxu0 %v2861_v53  ;;  %1479 = vmatprep.mubr.bf16.mxu1 %v2861_v53 }
 0x63e   :  { %1409 = vmatpush1.bf16.msra.mxu0 %v2601_v10  ;;  %1450 = vmatpush1.bf16.msra.mxu1 %v2604_v15 }
 0x63f   :  { %1410 = vmatprep.subr.bf16.mxu0 %v2607_v16  ;;  %1451 = vmatprep.subr.bf16.mxu1 %v2610_v17  ;;  %v2878_v16 = vld [vmem:[#allocation32_spill] sm:$0xff] }
 0x642   :  { %1411 = vmatpush1.bf16.msra.mxu0 %v2613_v18  ;;  %1452 = vmatpush1.bf16.msra.mxu1 %v2616_v19 }
 0x643   :  { %1412 = vmatprep.subr.bf16.mxu0 %v2670_v5  ;;  %1453 = vmatprep.subr.bf16.mxu1 %v2673_v54  ;;  %v2879_v54 = vld [vmem:[#allocation33_spill] sm:$0xff] }
 0x646   :  { %1413 = vmatpush1.bf16.msra.mxu0 %v2676_v55  ;;  %1454 = vmatpush1.bf16.msra.mxu1 %v2679_v45  ;;  %v2880_v45 = vld [vmem:[#allocation31_spill] sm:$0xff] }
 0x647   :  { %1414 = vmatprep.subr.bf16.mxu0 %v2682_v61  ;;  %1455 = vmatprep.subr.bf16.mxu1 %v2685_v1 }
 0x64a   :  { %1415 = vmatpush1.bf16.msra.mxu0 %v2688_v4  ;;  %1456 = vmatpush1.bf16.msra.mxu1 %v2691_v2 }
 0x64b   :  { %1416 = vmatprep.subr.bf16.mxu0 %v2694_v6  ;;  %1457 = vmatprep.subr.bf16.mxu1 %v2697_v40 }
 0x64e   :  { %1417 = vmatpush1.bf16.msra.mxu0 %v2700_v60  ;;  %1458 = vmatpush1.bf16.msra.mxu1 %v2703_v26 }
 0x64f   :  { %1418 = vmatprep.subr.bf16.mxu0 %v2706_v27  ;;  %1459 = vmatprep.subr.bf16.mxu1 %v2709_v28 }
 0x652   :  { %1419 = vmatpush1.bf16.msra.mxu0 %v2712_v29  ;;  %1460 = vmatpush1.bf16.msra.mxu1 %v2715_v31 }
 0x653   :  { %1420 = vmatprep.subr.bf16.mxu0 %v2718_v32  ;;  %1461 = vmatprep.subr.bf16.mxu1 %v2721_v33  ;;  %v1401_v32 = vpop.permute.xlu0 %1400 }
 0x654   :  { %vm1402_vm15 = vcmp.eq.s32.totalorder %v1401_v32, 1 }
 0x656   :  { %1421 = vmatpush1.bf16.msra.mxu0 %v2724_v34  ;;  %1462 = vmatpush1.bf16.msra.mxu1 %v2727_v35 }
 0x6f9   :  { %v1319_v53 = vpop.f32.mrf.mxu0  ;;  %v1360_v20 = vpop.f32.mrf.mxu1 }
 0x6fa   :  { %v1367_v62 = vadd.f32 %v1319_v53, %v2877_v13  ;;  %v1369_v61 = vadd.f32 %v1360_v20, %v2880_v45  ;;  %v1522_v13 = vpop.permute.xlu1 %1521 }
 0x6fb   :  { %v1321_v14 = vpop.f32.mrf.mxu0  ;;  %v1362_v10 = vpop.f32.mrf.mxu1  ;;  %vm1523_vm0 = vcmp.eq.s32.totalorder %v1522_v13, 1 }
 0x6fc   :  { %v1743_v15 = vmul.f32 -1.442695, %v1367_v62  ;;  %v1368_v17 = vadd.f32 %v1321_v14, %v2878_v16  ;;  %v1370_v55 = vadd.f32 %v1362_v10, %v2879_v54 }
 0x6fd   :  { %v1323_v18 = vpop.f32.mrf.mxu0  ;;  %v1364_v19 = vpop.f32.mrf.mxu1 }
 0x6fe   :  { %1957 = vpow2.f32 %v1743_v15  ;;  %v1744_v7 = vmul.f32 -1.442695, %v1368_v17  ;;  %v1745_v1 = vmul.f32 -1.442695, %v1370_v55 }
 0x6ff   :  { %v1324_v39 = vpop.f32.mrf.mxu0  ;;  %v1365_v5 = vpop.f32.mrf.mxu1 }
 0x700   :  { %1959 = vpow2.f32 %v1744_v7 }
 0x701   :  { %1961 = vtanh.f32 %v1369_v61 }
 0x702   :  { %1963 = vpow2.f32 %v1745_v1 }
 0x70b   :  { %v1958_v4 = vpop.eup %1957 }
 0x70c   :  { %v1374_v2 = vadd.f32 1.0, %v1958_v4 }
 0x70d   :  { %v1960_v6 = vpop.eup %1959 }
 0x70e   :  { %1965 = vrcp.f32 %v1374_v2  ;;  %v1380_v40 = vadd.f32 1.0, %v1960_v6  ;;  %v1962_v60 = vpop.eup %1961 }
 0x70f   :  { %v1964_v26 = vpop.eup %1963 }
 0x710   :  { %1967 = vrcp.f32 %v1380_v40  ;;  %v1387_v31 = vadd.f32 1.0, %v1964_v26 }
 0x712   :  { %1969 = vrcp.f32 %v1387_v31 }
 0x71b   :  { %v1966_v27 = vpop.eup %1965 }
 0x71c   :  { %v1391_v28 = vmul.f32 %v1966_v27, %v1962_v60 }
 0x71d   :  { %v1968_v29 = vpop.eup %1967 }
 0x71e   :  { %v1390_v33 = vmul.f32 %v1968_v29, %v2738_v37 }
 0x71f   :  { %v1970_v21 = vpop.eup %1969 }
 0x720   :  { %v1392_v34 = vadd.f32 %v1391_v28, %v1390_v33 }
 0x722   :  { %1971 = vtanh.f32 %v1392_v34  ;;  %v1404_v35 = vsel %vm1402_vm15, %v1392_v34, %v2738_v37 }
 0x72f   :  { %v1972_v22 = vpop.eup %1971 }
 0x730   :  { %v1394_v23 = vmul.f32 %v1972_v22, %v1970_v21 }
 0x732   :  { %v1403_v9 = vsel %vm1402_vm15, %v1394_v23, %v2741_v46 }
 0x733   :  { %v1405_v52 = vpack.c.bf16 %v1403_v9, %v1403_v9 }
 0x735   :  { %1439 = vmatmul.mubr.bf16.vlgmr.msra.gmra.mxu0 %v1405_v52  ;;  %1480 = vmatmul.mubr.bf16.vlgmr.msra.gmra.mxu1 %v1405_v52 }
 0x7f5   :  { %v1440_v59 = vpop.f32.mrf.mxu0  ;;  %v1481_v24 = vpop.f32.mrf.mxu1 }
 0x7f6   :  { %v1488_v25 = vadd.f32 %v1440_v59, %v2881_v8  ;;  %v1490_v36 = vadd.f32 %v1481_v24, %v2882_v51 }
 0x7f7   :  { %v1442_v49 = vpop.f32.mrf.mxu0  ;;  %v1483_v11 = vpop.f32.mrf.mxu1 }
 0x7f8   :  { %v1746_v30 = vmul.f32 -1.442695, %v1488_v25  ;;  %v1489_v12 = vadd.f32 %v1442_v49, %v2421_v0  ;;  %v1491_v50 = vadd.f32 %v1483_v11, %v2424_v56 }
 0x7f9   :  { %v1444_v48 = vpop.f32.mrf.mxu0  ;;  %v1485_v63 = vpop.f32.mrf.mxu1 }
 0x7fa   :  { %1973 = vpow2.f32 %v1746_v30  ;;  %v1747_v3 = vmul.f32 -1.442695, %v1489_v12  ;;  %v1748_v38 = vmul.f32 -1.442695, %v1491_v50 }
 0x7fb   :  { %v1445_v57 = vpop.f32.mrf.mxu0  ;;  %v1486_v58 = vpop.f32.mrf.mxu1 }
 0x7fc   :  { %1975 = vpow2.f32 %v1747_v3 }
 0x7fd   :  { %1977 = vtanh.f32 %v1490_v36 }
 0x7fe   :  { %1979 = vpow2.f32 %v1748_v38 }
 0x807   :  { %v1974_v41 = vpop.eup %1973 }
 0x808   :  { %v1495_v37 = vadd.f32 1.0, %v1974_v41 }
 0x809   :  { %v1976_v42 = vpop.eup %1975 }
 0x80a   :  { %1981 = vrcp.f32 %v1495_v37  ;;  %v1501_v43 = vadd.f32 1.0, %v1976_v42  ;;  %v1978_v0 = vpop.eup %1977 }
 0x80b   :  { %v1980_v44 = vpop.eup %1979 }
 0x80c   :  { %1983 = vrcp.f32 %v1501_v43  ;;  %v1508_v20 = vadd.f32 1.0, %v1980_v44 }
 0x80e   :  { %1985 = vrcp.f32 %v1508_v20 }
 0x817   :  { %v1982_v46 = vpop.eup %1981 }
 0x818   :  { %v1512_v47 = vmul.f32 %v1982_v46, %v1978_v0 }
 0x819   :  { %v1984_v53 = vpop.eup %1983 }
 0x81a   :  { %v1511_v62 = vmul.f32 %v1984_v53, %v1404_v35 }
 0x81b   :  { %v1986_v10 = vpop.eup %1985 }
 0x81c   :  { %v1513_v56 = vadd.f32 %v1512_v47, %v1511_v62 }
 0x81e   :  { %1987 = vtanh.f32 %v1513_v56  ;;  %v1525_v14 = vsel %vm1523_vm0, %v1513_v56, %v1404_v35 }
 0x81f   :  { %1527 = vst [vmem:[#allocation3] sm:$0xff] %v1525_v14 }
 0x82b   :  { %v1988_v15 = vpop.eup %1987 }
 0x82c   :  { %v1515_v16 = vmul.f32 %v1988_v15, %v1986_v10 }
 0x82e   :  { %v1524_v17 = vsel %vm1523_vm0, %v1515_v16, %v1403_v9 }
 0x82f   :  { %1526 = vst [vmem:[#allocation2] sm:$0xff] %v1524_v17 }
 0x830 PF:  { %v2883_v18 = vmov 0.0   ;;  %v2021_v19 = vld [vmem:[%s2833_s6 + $0x38] sm:$0xff]   ;;  %vm2101_vm1 = vmmov 0   ;;  %v2022_v7 = vld [vmem:[%s2833_s6 + $0x30] sm:$0xff]   ;;  %v2023_v39 = vld [vmem:[%s2833_s6 + $0x28] sm:$0xff]   ;;  %s2102_s20 = smov [#allocation11]  }
 0x831   :  { %1767 = vmatprep.subr.bf16.mxu0 %v2883_v18  ;;  %1783 = vmatprep.mubr.msk.bf16.mxu0 %vm2101_vm1, %v2883_v18  ;;  %v2024_v5 = vld [vmem:[%s2833_s6 + $0x20] sm:$0xff]   ;;  %v2025_v54 = vld [vmem:[%s2833_s6 + $0x18] sm:$0xff]   ;;  %v2026_v55 = vld [vmem:[%s2833_s6 + $0x10] sm:$0xff]   ;;  %s1651_s4 = sshll.u32 %s2102_s20, 4  ;;  %s1652_s4 = int_to_ptr.vmem [resolvable:$true] %s1651_s4 }
 0x832   :  { %1768 = vmatpush3.bf16.msra.mxu0 %v2021_v19  ;;  %v2027_v45 = vld [vmem:[%s2833_s6 + $0x8] sm:$0xff]   ;;  %v2028_v61 = vld [vmem:[%s2833_s6] sm:$0xff]   ;;  %s2069_s21 = scalar_lea.vmem %s1652_s4, 128  ;;  %p2074_p0 = scmp.lt.s32.totalorder %s1652_s4, %s1652_s4 }
 0x833   :  { %1769 = vmatprep.subr.bf16.mxu0 %v2883_v18  ;;  %v1749_v2 = vld [vmem:[%s2834_s7] ss:$0 sm:$0xff]  ;;  %p2070_p13 = scmp.ne.s32.totalorder %s1652_s4, %s2069_s21  ;;  %p2075_p1 = scmp.lt.s32.totalorder %s2069_s21, %s2069_s21 }
 0x835   :  { %p2076_p2 = por %p2075_p1, %p2074_p0 }
 0x836   :  { %1770 = vmatpush3.bf16.msra.mxu0 %v2022_v7  ;;  %v1531_v1 = vld [vmem:[#allocation2] sm:$0xff] }
 0x837   :  { %1771 = vmatprep.subr.bf16.mxu0 %v2883_v18  ;;  %v1532_v4 = vpack.c.bf16 %v1531_v1, %v1531_v1  ;;  %p2077_p3 = pnand %p2076_p2, %p2070_p13 }
 0x83a   :  { %1772 = vmatpush3.bf16.msra.mxu0 %v2023_v39 }
 0x83b   :  { %1773 = vmatprep.subr.bf16.mxu0 %v2883_v18 }
 0x83e   :  { %1774 = vmatpush3.bf16.msra.mxu0 %v2024_v5 }
 0x83f   :  { %1775 = vmatprep.subr.bf16.mxu0 %v2883_v18 }
 0x842   :  { %1776 = vmatpush3.bf16.msra.mxu0 %v2025_v54 }
 0x843   :  { %1777 = vmatprep.subr.bf16.mxu0 %v2883_v18 }
 0x846   :  { %1778 = vmatpush3.bf16.msra.mxu0 %v2026_v55 }
 0x847   :  { %1779 = vmatprep.subr.bf16.mxu0 %v2883_v18 }
 0x84a   :  { %1780 = vmatpush3.bf16.msra.mxu0 %v2027_v45 }
 0x84b   :  { %1781 = vmatprep.subr.bf16.mxu0 %v2883_v18 }
 0x84e   :  { %1782 = vmatpush3.bf16.msra.mxu0 %v2028_v61 }
 0x851   :  { %1784 = vmatmul.mubr.bf16.vlgmr.msra.gmra.mxu0 %v1532_v4 }
 0x911   :  { %v1638_v6 = vpop.f32.mrf.mxu0 }
 0x912   :  { %v1639_v40 = vadd.f32 %v1749_v2, %v1638_v6 }
 0x913   :  { %v1785_v60 = vpop.f32.mrf.mxu0 }
 0x914   :  { %1644 = vst [vmem:[#allocation11] sm:$0xff] %v1639_v40 }
 0x915   :  { %v1641_v26 = vpop.f32.mrf.mxu0 }
 0x916   :  { %2080 = shalt.err (!%p2077_p3)
}
 0x917   :  { %1654 = dma.vmem_to_hbm [thread:$0]  %s1652_s4, 128, %s2835_s8, [#allocation8]   ;;  %v1786_v27 = vpop.f32.mrf.mxu0 }
 0x918   :  { %2093 = dma.done.wait [#allocation8], 128  }
 0x919   :  { %2094 = vsyncadd [#allocation8], 4294967168 }
 0x91a   :  { %1658 = vsyncpa [#allocation7], 1 }
 0x91b   :  { %1659 = vsyncpa [#allocation10], 1 }
 0x91c   :  { %1660 = vsyncpa [#allocation8], 1 }

</bundles_post_ra>
